<compile_context>
chip_gen: v5e
topology: v5e:2x2
jax: 0.10.0
libtpu: 0.0.40
codegen_flags: <defaults>
</compile_context>

<pallas_src>
import jax
import jax.numpy as jnp
import numpy as np
from jax.experimental import pallas as pl
from jax.experimental.pallas import tpu as pltpu


def _gaussian_lstm_kernel(x_ref, w1_ref, b1_ref, wih_ref, whh_ref, blstm_ref,
                          whead_ref, bhead_ref, hx_ref, cx_ref,
                          mu_ref, var_ref, hy_ref, cy_ref,
                          hseq_ref):
    B, T, n_in = x_ref.shape
    H = whh_ref.shape[0]
    n_out = whead_ref.shape[1] // 2

    # ---- Phase 1: hoisted (non-recurrent) input projection, all timesteps at once.
    x2 = x_ref[...].reshape(B * T, n_in)
    pre = jnp.maximum(
        jnp.dot(x2, w1_ref[...], preferred_element_type=jnp.float32) + b1_ref[...],
        0.0)
    gx = (jnp.dot(pre, wih_ref[...], preferred_element_type=jnp.float32)
          + blstm_ref[...]).reshape(B, T, 4 * H)

    # ---- Phase 2: sequential LSTM recurrence (PyTorch gate order i, f, g, o).
    whh = whh_ref[...]
    h = hx_ref[...]
    c = cx_ref[...]
    for t in range(T):                       # static T -> fully unrolled
        gates = gx[:, t, :] + jnp.dot(h, whh, preferred_element_type=jnp.float32)
        # Two full-width (B, 4H) EUP passes instead of four narrow ones.
        sg = jax.nn.sigmoid(gates)
        th = jnp.tanh(gates)
        i_g = sg[:, 0 * H:1 * H]
        f_g = sg[:, 1 * H:2 * H]
        g_g = th[:, 2 * H:3 * H]
        o_g = sg[:, 3 * H:4 * H]
        c = f_g * c + i_g * g_g
        h = o_g * jnp.tanh(c)
        hseq_ref[:, t, :] = h                # stage h_t for the batched head matmul

    # Final hidden / cell state, written once.
    hy_ref[...] = h
    cy_ref[...] = c

    # ---- Phase 3: fused mu / logvar heads as one batched matmul, split after.
    hs2 = hseq_ref[...].reshape(B * T, H)
    head = (jnp.dot(hs2, whead_ref[...], preferred_element_type=jnp.float32)
            + bhead_ref[...]).reshape(B, T, 2 * n_out)
    mu_ref[...] = head[:, :, :n_out]
    var_ref[...] = jnp.exp(0.5 * head[:, :, n_out:])


def gaussian_lstm_forward(x, hx, cx, params):
    """x: (B, T, n_input); hx, cx: (1, B, n_hidden).
    Returns (mu, var, (hy, cy)) matching the PyTorch module."""
    B, T, n_in = x.shape
    H = params["w1"].shape[1]
    n_out = params["wmu"].shape[1]

    # Fuse the two output heads into a single (H, 2*n_out) weight / bias.
    whead = jnp.concatenate([params["wmu"], params["wvar"]], axis=1)
    bhead = jnp.concatenate([params["bmu"], params["bvar"]], axis=1)

    mu, var, hy, cy = pl.pallas_call(
        _gaussian_lstm_kernel,
        out_shape=(
            jax.ShapeDtypeStruct((B, T, n_out), jnp.float32),   # mu (batch-first)
            jax.ShapeDtypeStruct((B, T, n_out), jnp.float32),   # var (batch-first)
            jax.ShapeDtypeStruct((B, H), jnp.float32),          # hy
            jax.ShapeDtypeStruct((B, H), jnp.float32),          # cy
        ),
        scratch_shapes=[
            pltpu.VMEM((B, T, H), jnp.float32),                 # h_t slab for head matmul
        ],
    )(x, params["w1"], params["b1"], params["wih"], params["whh"],
      params["blstm"], whead, bhead, hx[0], cx[0])

    return mu, var, (hy[None], cy[None])


def reference_forward(x, hx, cx, params):
    """Pure-JAX reference of the PyTorch forward pass."""
    pre = jnp.maximum(jnp.einsum("bti,ih->bth", x, params["w1"]) + params["b1"][0], 0.0)

    def step(carry, p_t):
        h, c = carry
        gates = p_t @ params["wih"] + h @ params["whh"] + params["blstm"][0]
        H = h.shape[1]
        i = jax.nn.sigmoid(gates[:, 0 * H:1 * H])
        f = jax.nn.sigmoid(gates[:, 1 * H:2 * H])
        g = jnp.tanh(gates[:, 2 * H:3 * H])
        o = jax.nn.sigmoid(gates[:, 3 * H:4 * H])
        c = f * c + i * g
        h = o * jnp.tanh(c)
        return (h, c), h

    (hy, cy), hs = jax.lax.scan(step, (hx[0], cx[0]),
                                jnp.transpose(pre, (1, 0, 2)))
    hs = jnp.transpose(hs, (1, 0, 2))                # (B, T, H)
    mu = jnp.einsum("bth,ho->bto", hs, params["wmu"]) + params["bmu"][0]
    var = jnp.exp(0.5 * (jnp.einsum("bth,ho->bto", hs, params["wvar"])
                         + params["bvar"][0]))
    return mu, var, (hy[None], cy[None])


if __name__ == "__main__":
    # Small shapes: batch=2, seq=8, n_input=16, n_hidden=32, n_output=8
    B, T, N_IN, H, N_OUT = 2, 8, 16, 32, 8

    key = jax.random.PRNGKey(0)
    ks = jax.random.split(key, 16)

    def u(k, shape, scale=0.1):
        return (jax.random.uniform(k, shape, jnp.float32, -1.0, 1.0) * scale)

    params = {
        "w1":    u(ks[0], (N_IN, H)),           # Linear l1 weight (transposed)
        "b1":    u(ks[1], (1, H)),
        "wih":   u(ks[2], (H, 4 * H)),          # LSTM weight_ih_l0, transposed
        "whh":   u(ks[3], (H, 4 * H)),          # LSTM weight_hh_l0, transposed
        "blstm": u(ks[4], (1, 4 * H)),          # bias_ih_l0 + bias_hh_l0 combined
        "wmu":   u(ks[5], (H, N_OUT)),          # l3_mu weight (transposed)
        "bmu":   u(ks[6], (1, N_OUT)),
        "wvar":  u(ks[7], (H, N_OUT)),          # l3_var weight (transposed)
        "bvar":  u(ks[8], (1, N_OUT)),
    }

    x = jax.random.normal(ks[9], (B, T, N_IN), jnp.float32)
    hx = jax.random.normal(ks[10], (1, B, H), jnp.float32) * 0.1
    cx = jax.random.normal(ks[11], (1, B, H), jnp.float32) * 0.1

    mu, var, (hy, cy) = gaussian_lstm_forward(x, hx, cx, params)
    jax.block_until_ready((mu, var, hy, cy))

    mu_r, var_r, (hy_r, cy_r) = reference_forward(x, hx, cx, params)
    np.testing.assert_allclose(np.asarray(mu), np.asarray(mu_r), atol=1e-5, rtol=1e-5)
    np.testing.assert_allclose(np.asarray(var), np.asarray(var_r), atol=1e-5, rtol=1e-5)
    np.testing.assert_allclose(np.asarray(hy), np.asarray(hy_r), atol=1e-5, rtol=1e-5)
    np.testing.assert_allclose(np.asarray(cy), np.asarray(cy_r), atol=1e-5, rtol=1e-5)

    print("KERNEL_OK")
</pallas_src>

<mosaic_0001>
module attributes {stable_mosaic.version = 11 : i64} {
  func.func @_gaussian_lstm_kernel(%arg0: memref<2x8x16xf32, #tpu.memory_space<vmem>>, %arg1: memref<16x32xf32, #tpu.memory_space<vmem>>, %arg2: memref<1x32xf32, #tpu.memory_space<vmem>>, %arg3: memref<32x128xf32, #tpu.memory_space<vmem>>, %arg4: memref<32x128xf32, #tpu.memory_space<vmem>>, %arg5: memref<1x128xf32, #tpu.memory_space<vmem>>, %arg6: memref<32x16xf32, #tpu.memory_space<vmem>>, %arg7: memref<1x16xf32, #tpu.memory_space<vmem>>, %arg8: memref<2x32xf32, #tpu.memory_space<vmem>>, %arg9: memref<2x32xf32, #tpu.memory_space<vmem>>, %arg10: memref<2x8x8xf32, #tpu.memory_space<vmem>>, %arg11: memref<2x8x8xf32, #tpu.memory_space<vmem>>, %arg12: memref<2x32xf32, #tpu.memory_space<vmem>>, %arg13: memref<2x32xf32, #tpu.memory_space<vmem>>, %arg14: memref<2x8x32xf32, #tpu.memory_space<vmem>>) attributes {dimension_semantics = [], scalar_prefetch = 0 : i64, scratch_operands = 1 : i64, tpu.core_type = #tpu.core_type<tc>} {
    %c0 = arith.constant 0 : index
    %c0_0 = arith.constant 0 : index
    %c0_1 = arith.constant 0 : index
    %0 = vector.load %arg0[%c0, %c0_0, %c0_1] : memref<2x8x16xf32, #tpu.memory_space<vmem>>, vector<2x8x16xf32>
    %1 = vector.shape_cast %0 : vector<2x8x16xf32> to vector<16x16xf32>
    %c0_2 = arith.constant 0 : index
    %c0_3 = arith.constant 0 : index
    %2 = vector.load %arg1[%c0_2, %c0_3] : memref<16x32xf32, #tpu.memory_space<vmem>>, vector<16x32xf32>
    %cst = arith.constant dense<0.000000e+00> : vector<16x32xf32>
    %3 = tpu.matmul %1, %2, %cst {dimension_numbers = #tpu.dot_dimension_numbers<[1], [0], [0], [1], [0, 0, 1, 1], [], []>} : vector<16x16xf32>, vector<16x32xf32>, vector<16x32xf32> -> vector<16x32xf32>
    %c0_4 = arith.constant 0 : index
    %c0_5 = arith.constant 0 : index
    %4 = vector.load %arg2[%c0_4, %c0_5] : memref<1x32xf32, #tpu.memory_space<vmem>>, vector<1x32xf32>
    %5 = vector.broadcast %4 : vector<1x32xf32> to vector<16x32xf32>
    %6 = arith.addf %3, %5 : vector<16x32xf32>
    %cst_6 = arith.constant 0.000000e+00 : f32
    %7 = vector.broadcast %cst_6 : f32 to vector<16x32xf32>
    %8 = arith.maximumf %6, %7 : vector<16x32xf32>
    %c0_7 = arith.constant 0 : index
    %c0_8 = arith.constant 0 : index
    %9 = vector.load %arg3[%c0_7, %c0_8] : memref<32x128xf32, #tpu.memory_space<vmem>>, vector<32x128xf32>
    %cst_9 = arith.constant dense<0.000000e+00> : vector<16x128xf32>
    %10 = tpu.matmul %8, %9, %cst_9 {dimension_numbers = #tpu.dot_dimension_numbers<[1], [0], [0], [1], [0, 0, 1, 1], [], []>} : vector<16x32xf32>, vector<32x128xf32>, vector<16x128xf32> -> vector<16x128xf32>
    %c0_10 = arith.constant 0 : index
    %c0_11 = arith.constant 0 : index
    %11 = vector.load %arg5[%c0_10, %c0_11] : memref<1x128xf32, #tpu.memory_space<vmem>>, vector<1x128xf32>
    %12 = vector.broadcast %11 : vector<1x128xf32> to vector<16x128xf32>
    %13 = arith.addf %10, %12 : vector<16x128xf32>
    %14 = vector.shape_cast %13 : vector<16x128xf32> to vector<2x8x128xf32>
    %c0_12 = arith.constant 0 : index
    %c0_13 = arith.constant 0 : index
    %15 = vector.load %arg4[%c0_12, %c0_13] : memref<32x128xf32, #tpu.memory_space<vmem>>, vector<32x128xf32>
    %c0_14 = arith.constant 0 : index
    %c0_15 = arith.constant 0 : index
    %16 = vector.load %arg8[%c0_14, %c0_15] : memref<2x32xf32, #tpu.memory_space<vmem>>, vector<2x32xf32>
    %c0_16 = arith.constant 0 : index
    %c0_17 = arith.constant 0 : index
    %17 = vector.load %arg9[%c0_16, %c0_17] : memref<2x32xf32, #tpu.memory_space<vmem>>, vector<2x32xf32>
    %18 = vector.extract_strided_slice %14 {offsets = [0, 0, 0], sizes = [2, 1, 128], strides = [1, 1, 1]} : vector<2x8x128xf32> to vector<2x1x128xf32>
    %19 = vector.shape_cast %18 : vector<2x1x128xf32> to vector<2x128xf32>
    %cst_18 = arith.constant dense<0.000000e+00> : vector<2x128xf32>
    %20 = tpu.matmul %16, %15, %cst_18 {dimension_numbers = #tpu.dot_dimension_numbers<[1], [0], [0], [1], [0, 0, 1, 1], [], []>} : vector<2x32xf32>, vector<32x128xf32>, vector<2x128xf32> -> vector<2x128xf32>
    %21 = arith.addf %19, %20 : vector<2x128xf32>
    %22 = arith.negf %21 : vector<2x128xf32>
    %23 = math.exp %22 : vector<2x128xf32>
    %cst_19 = arith.constant 1.000000e+00 : f32
    %24 = vector.broadcast %cst_19 : f32 to vector<2x128xf32>
    %25 = arith.addf %24, %23 : vector<2x128xf32>
    %26 = arith.divf %24, %25 : vector<2x128xf32>
    %27 = math.tanh %21 : vector<2x128xf32>
    %28 = vector.extract_strided_slice %26 {offsets = [0, 0], sizes = [2, 32], strides = [1, 1]} : vector<2x128xf32> to vector<2x32xf32>
    %29 = vector.extract_strided_slice %26 {offsets = [0, 32], sizes = [2, 32], strides = [1, 1]} : vector<2x128xf32> to vector<2x32xf32>
    %30 = vector.extract_strided_slice %27 {offsets = [0, 64], sizes = [2, 32], strides = [1, 1]} : vector<2x128xf32> to vector<2x32xf32>
    %31 = vector.extract_strided_slice %26 {offsets = [0, 96], sizes = [2, 32], strides = [1, 1]} : vector<2x128xf32> to vector<2x32xf32>
    %32 = arith.mulf %29, %17 : vector<2x32xf32>
    %33 = arith.mulf %28, %30 : vector<2x32xf32>
    %34 = arith.addf %32, %33 : vector<2x32xf32>
    %35 = math.tanh %34 : vector<2x32xf32>
    %36 = arith.mulf %31, %35 : vector<2x32xf32>
    %c0_20 = arith.constant 0 : index
    %c0_21 = arith.constant 0 : index
    %c0_22 = arith.constant 0 : index
    %37 = vector.load %arg14[%c0_20, %c0_21, %c0_22] : memref<2x8x32xf32, #tpu.memory_space<vmem>>, vector<2x1x32xf32>
    %38 = vector.shape_cast %37 : vector<2x1x32xf32> to vector<2x32xf32>
    %39 = vector.shape_cast %36 : vector<2x32xf32> to vector<2x1x32xf32>
    tpu.vector_store %arg14[%c0_20, %c0_21, %c0_22], %39 {strides = array<i32>} : memref<2x8x32xf32, #tpu.memory_space<vmem>>, vector<2x1x32xf32>,
    %40 = vector.extract_strided_slice %14 {offsets = [0, 1, 0], sizes = [2, 1, 128], strides = [1, 1, 1]} : vector<2x8x128xf32> to vector<2x1x128xf32>
    %41 = vector.shape_cast %40 : vector<2x1x128xf32> to vector<2x128xf32>
    %cst_23 = arith.constant dense<0.000000e+00> : vector<2x128xf32>
    %42 = tpu.matmul %36, %15, %cst_23 {dimension_numbers = #tpu.dot_dimension_numbers<[1], [0], [0], [1], [0, 0, 1, 1], [], []>} : vector<2x32xf32>, vector<32x128xf32>, vector<2x128xf32> -> vector<2x128xf32>
    %43 = arith.addf %41, %42 : vector<2x128xf32>
    %44 = arith.negf %43 : vector<2x128xf32>
    %45 = math.exp %44 : vector<2x128xf32>
    %cst_24 = arith.constant 1.000000e+00 : f32
    %46 = vector.broadcast %cst_24 : f32 to vector<2x128xf32>
    %47 = arith.addf %46, %45 : vector<2x128xf32>
    %48 = arith.divf %46, %47 : vector<2x128xf32>
    %49 = math.tanh %43 : vector<2x128xf32>
    %50 = vector.extract_strided_slice %48 {offsets = [0, 0], sizes = [2, 32], strides = [1, 1]} : vector<2x128xf32> to vector<2x32xf32>
    %51 = vector.extract_strided_slice %48 {offsets = [0, 32], sizes = [2, 32], strides = [1, 1]} : vector<2x128xf32> to vector<2x32xf32>
    %52 = vector.extract_strided_slice %49 {offsets = [0, 64], sizes = [2, 32], strides = [1, 1]} : vector<2x128xf32> to vector<2x32xf32>
    %53 = vector.extract_strided_slice %48 {offsets = [0, 96], sizes = [2, 32], strides = [1, 1]} : vector<2x128xf32> to vector<2x32xf32>
    %54 = arith.mulf %51, %34 : vector<2x32xf32>
    %55 = arith.mulf %50, %52 : vector<2x32xf32>
    %56 = arith.addf %54, %55 : vector<2x32xf32>
    %57 = math.tanh %56 : vector<2x32xf32>
    %58 = arith.mulf %53, %57 : vector<2x32xf32>
    %c0_25 = arith.constant 0 : index
    %c1 = arith.constant 1 : index
    %c0_26 = arith.constant 0 : index
    %59 = vector.load %arg14[%c0_25, %c1, %c0_26] : memref<2x8x32xf32, #tpu.memory_space<vmem>>, vector<2x1x32xf32>
    %60 = vector.shape_cast %59 : vector<2x1x32xf32> to vector<2x32xf32>
    %61 = vector.shape_cast %58 : vector<2x32xf32> to vector<2x1x32xf32>
    tpu.vector_store %arg14[%c0_25, %c1, %c0_26], %61 {strides = array<i32>} : memref<2x8x32xf32, #tpu.memory_space<vmem>>, vector<2x1x32xf32>,
    %62 = vector.extract_strided_slice %14 {offsets = [0, 2, 0], sizes = [2, 1, 128], strides = [1, 1, 1]} : vector<2x8x128xf32> to vector<2x1x128xf32>
    %63 = vector.shape_cast %62 : vector<2x1x128xf32> to vector<2x128xf32>
    %cst_27 = arith.constant dense<0.000000e+00> : vector<2x128xf32>
    %64 = tpu.matmul %58, %15, %cst_27 {dimension_numbers = #tpu.dot_dimension_numbers<[1], [0], [0], [1], [0, 0, 1, 1], [], []>} : vector<2x32xf32>, vector<32x128xf32>, vector<2x128xf32> -> vector<2x128xf32>
    %65 = arith.addf %63, %64 : vector<2x128xf32>
    %66 = arith.negf %65 : vector<2x128xf32>
    %67 = math.exp %66 : vector<2x128xf32>
    %cst_28 = arith.constant 1.000000e+00 : f32
    %68 = vector.broadcast %cst_28 : f32 to vector<2x128xf32>
    %69 = arith.addf %68, %67 : vector<2x128xf32>
    %70 = arith.divf %68, %69 : vector<2x128xf32>
    %71 = math.tanh %65 : vector<2x128xf32>
    %72 = vector.extract_strided_slice %70 {offsets = [0, 0], sizes = [2, 32], strides = [1, 1]} : vector<2x128xf32> to vector<2x32xf32>
    %73 = vector.extract_strided_slice %70 {offsets = [0, 32], sizes = [2, 32], strides = [1, 1]} : vector<2x128xf32> to vector<2x32xf32>
    %74 = vector.extract_strided_slice %71 {offsets = [0, 64], sizes = [2, 32], strides = [1, 1]} : vector<2x128xf32> to vector<2x32xf32>
    %75 = vector.extract_strided_slice %70 {offsets = [0, 96], sizes = [2, 32], strides = [1, 1]} : vector<2x128xf32> to vector<2x32xf32>
    %76 = arith.mulf %73, %56 : vector<2x32xf32>
    %77 = arith.mulf %72, %74 : vector<2x32xf32>
    %78 = arith.addf %76, %77 : vector<2x32xf32>
    %79 = math.tanh %78 : vector<2x32xf32>
    %80 = arith.mulf %75, %79 : vector<2x32xf32>
    %c0_29 = arith.constant 0 : index
    %c2 = arith.constant 2 : index
    %c0_30 = arith.constant 0 : index
    %81 = vector.load %arg14[%c0_29, %c2, %c0_30] : memref<2x8x32xf32, #tpu.memory_space<vmem>>, vector<2x1x32xf32>
    %82 = vector.shape_cast %81 : vector<2x1x32xf32> to vector<2x32xf32>
    %83 = vector.shape_cast %80 : vector<2x32xf32> to vector<2x1x32xf32>
    tpu.vector_store %arg14[%c0_29, %c2, %c0_30], %83 {strides = array<i32>} : memref<2x8x32xf32, #tpu.memory_space<vmem>>, vector<2x1x32xf32>,
    %84 = vector.extract_strided_slice %14 {offsets = [0, 3, 0], sizes = [2, 1, 128], strides = [1, 1, 1]} : vector<2x8x128xf32> to vector<2x1x128xf32>
    %85 = vector.shape_cast %84 : vector<2x1x128xf32> to vector<2x128xf32>
    %cst_31 = arith.constant dense<0.000000e+00> : vector<2x128xf32>
    %86 = tpu.matmul %80, %15, %cst_31 {dimension_numbers = #tpu.dot_dimension_numbers<[1], [0], [0], [1], [0, 0, 1, 1], [], []>} : vector<2x32xf32>, vector<32x128xf32>, vector<2x128xf32> -> vector<2x128xf32>
    %87 = arith.addf %85, %86 : vector<2x128xf32>
    %88 = arith.negf %87 : vector<2x128xf32>
    %89 = math.exp %88 : vector<2x128xf32>
    %cst_32 = arith.constant 1.000000e+00 : f32
    %90 = vector.broadcast %cst_32 : f32 to vector<2x128xf32>
    %91 = arith.addf %90, %89 : vector<2x128xf32>
    %92 = arith.divf %90, %91 : vector<2x128xf32>
    %93 = math.tanh %87 : vector<2x128xf32>
    %94 = vector.extract_strided_slice %92 {offsets = [0, 0], sizes = [2, 32], strides = [1, 1]} : vector<2x128xf32> to vector<2x32xf32>
    %95 = vector.extract_strided_slice %92 {offsets = [0, 32], sizes = [2, 32], strides = [1, 1]} : vector<2x128xf32> to vector<2x32xf32>
    %96 = vector.extract_strided_slice %93 {offsets = [0, 64], sizes = [2, 32], strides = [1, 1]} : vector<2x128xf32> to vector<2x32xf32>
    %97 = vector.extract_strided_slice %92 {offsets = [0, 96], sizes = [2, 32], strides = [1, 1]} : vector<2x128xf32> to vector<2x32xf32>
    %98 = arith.mulf %95, %78 : vector<2x32xf32>
    %99 = arith.mulf %94, %96 : vector<2x32xf32>
    %100 = arith.addf %98, %99 : vector<2x32xf32>
    %101 = math.tanh %100 : vector<2x32xf32>
    %102 = arith.mulf %97, %101 : vector<2x32xf32>
    %c0_33 = arith.constant 0 : index
    %c3 = arith.constant 3 : index
    %c0_34 = arith.constant 0 : index
    %103 = vector.load %arg14[%c0_33, %c3, %c0_34] : memref<2x8x32xf32, #tpu.memory_space<vmem>>, vector<2x1x32xf32>
    %104 = vector.shape_cast %103 : vector<2x1x32xf32> to vector<2x32xf32>
    %105 = vector.shape_cast %102 : vector<2x32xf32> to vector<2x1x32xf32>
    tpu.vector_store %arg14[%c0_33, %c3, %c0_34], %105 {strides = array<i32>} : memref<2x8x32xf32, #tpu.memory_space<vmem>>, vector<2x1x32xf32>,
    %106 = vector.extract_strided_slice %14 {offsets = [0, 4, 0], sizes = [2, 1, 128], strides = [1, 1, 1]} : vector<2x8x128xf32> to vector<2x1x128xf32>
    %107 = vector.shape_cast %106 : vector<2x1x128xf32> to vector<2x128xf32>
    %cst_35 = arith.constant dense<0.000000e+00> : vector<2x128xf32>
    %108 = tpu.matmul %102, %15, %cst_35 {dimension_numbers = #tpu.dot_dimension_numbers<[1], [0], [0], [1], [0, 0, 1, 1], [], []>} : vector<2x32xf32>, vector<32x128xf32>, vector<2x128xf32> -> vector<2x128xf32>
    %109 = arith.addf %107, %108 : vector<2x128xf32>
    %110 = arith.negf %109 : vector<2x128xf32>
    %111 = math.exp %110 : vector<2x128xf32>
    %cst_36 = arith.constant 1.000000e+00 : f32
    %112 = vector.broadcast %cst_36 : f32 to vector<2x128xf32>
    %113 = arith.addf %112, %111 : vector<2x128xf32>
    %114 = arith.divf %112, %113 : vector<2x128xf32>
    %115 = math.tanh %109 : vector<2x128xf32>
    %116 = vector.extract_strided_slice %114 {offsets = [0, 0], sizes = [2, 32], strides = [1, 1]} : vector<2x128xf32> to vector<2x32xf32>
    %117 = vector.extract_strided_slice %114 {offsets = [0, 32], sizes = [2, 32], strides = [1, 1]} : vector<2x128xf32> to vector<2x32xf32>
    %118 = vector.extract_strided_slice %115 {offsets = [0, 64], sizes = [2, 32], strides = [1, 1]} : vector<2x128xf32> to vector<2x32xf32>
    %119 = vector.extract_strided_slice %114 {offsets = [0, 96], sizes = [2, 32], strides = [1, 1]} : vector<2x128xf32> to vector<2x32xf32>
    %120 = arith.mulf %117, %100 : vector<2x32xf32>
    %121 = arith.mulf %116, %118 : vector<2x32xf32>
    %122 = arith.addf %120, %121 : vector<2x32xf32>
    %123 = math.tanh %122 : vector<2x32xf32>
    %124 = arith.mulf %119, %123 : vector<2x32xf32>
    %c0_37 = arith.constant 0 : index
    %c4 = arith.constant 4 : index
    %c0_38 = arith.constant 0 : index
    %125 = vector.load %arg14[%c0_37, %c4, %c0_38] : memref<2x8x32xf32, #tpu.memory_space<vmem>>, vector<2x1x32xf32>
    %126 = vector.shape_cast %125 : vector<2x1x32xf32> to vector<2x32xf32>
    %127 = vector.shape_cast %124 : vector<2x32xf32> to vector<2x1x32xf32>
    tpu.vector_store %arg14[%c0_37, %c4, %c0_38], %127 {strides = array<i32>} : memref<2x8x32xf32, #tpu.memory_space<vmem>>, vector<2x1x32xf32>,
    %128 = vector.extract_strided_slice %14 {offsets = [0, 5, 0], sizes = [2, 1, 128], strides = [1, 1, 1]} : vector<2x8x128xf32> to vector<2x1x128xf32>
    %129 = vector.shape_cast %128 : vector<2x1x128xf32> to vector<2x128xf32>
    %cst_39 = arith.constant dense<0.000000e+00> : vector<2x128xf32>
    %130 = tpu.matmul %124, %15, %cst_39 {dimension_numbers = #tpu.dot_dimension_numbers<[1], [0], [0], [1], [0, 0, 1, 1], [], []>} : vector<2x32xf32>, vector<32x128xf32>, vector<2x128xf32> -> vector<2x128xf32>
    %131 = arith.addf %129, %130 : vector<2x128xf32>
    %132 = arith.negf %131 : vector<2x128xf32>
    %133 = math.exp %132 : vector<2x128xf32>
    %cst_40 = arith.constant 1.000000e+00 : f32
    %134 = vector.broadcast %cst_40 : f32 to vector<2x128xf32>
    %135 = arith.addf %134, %133 : vector<2x128xf32>
    %136 = arith.divf %134, %135 : vector<2x128xf32>
    %137 = math.tanh %131 : vector<2x128xf32>
    %138 = vector.extract_strided_slice %136 {offsets = [0, 0], sizes = [2, 32], strides = [1, 1]} : vector<2x128xf32> to vector<2x32xf32>
    %139 = vector.extract_strided_slice %136 {offsets = [0, 32], sizes = [2, 32], strides = [1, 1]} : vector<2x128xf32> to vector<2x32xf32>
    %140 = vector.extract_strided_slice %137 {offsets = [0, 64], sizes = [2, 32], strides = [1, 1]} : vector<2x128xf32> to vector<2x32xf32>
    %141 = vector.extract_strided_slice %136 {offsets = [0, 96], sizes = [2, 32], strides = [1, 1]} : vector<2x128xf32> to vector<2x32xf32>
    %142 = arith.mulf %139, %122 : vector<2x32xf32>
    %143 = arith.mulf %138, %140 : vector<2x32xf32>
    %144 = arith.addf %142, %143 : vector<2x32xf32>
    %145 = math.tanh %144 : vector<2x32xf32>
    %146 = arith.mulf %141, %145 : vector<2x32xf32>
    %c0_41 = arith.constant 0 : index
    %c5 = arith.constant 5 : index
    %c0_42 = arith.constant 0 : index
    %147 = vector.load %arg14[%c0_41, %c5, %c0_42] : memref<2x8x32xf32, #tpu.memory_space<vmem>>, vector<2x1x32xf32>
    %148 = vector.shape_cast %147 : vector<2x1x32xf32> to vector<2x32xf32>
    %149 = vector.shape_cast %146 : vector<2x32xf32> to vector<2x1x32xf32>
    tpu.vector_store %arg14[%c0_41, %c5, %c0_42], %149 {strides = array<i32>} : memref<2x8x32xf32, #tpu.memory_space<vmem>>, vector<2x1x32xf32>,
    %150 = vector.extract_strided_slice %14 {offsets = [0, 6, 0], sizes = [2, 1, 128], strides = [1, 1, 1]} : vector<2x8x128xf32> to vector<2x1x128xf32>
    %151 = vector.shape_cast %150 : vector<2x1x128xf32> to vector<2x128xf32>
    %cst_43 = arith.constant dense<0.000000e+00> : vector<2x128xf32>
    %152 = tpu.matmul %146, %15, %cst_43 {dimension_numbers = #tpu.dot_dimension_numbers<[1], [0], [0], [1], [0, 0, 1, 1], [], []>} : vector<2x32xf32>, vector<32x128xf32>, vector<2x128xf32> -> vector<2x128xf32>
    %153 = arith.addf %151, %152 : vector<2x128xf32>
    %154 = arith.negf %153 : vector<2x128xf32>
    %155 = math.exp %154 : vector<2x128xf32>
    %cst_44 = arith.constant 1.000000e+00 : f32
    %156 = vector.broadcast %cst_44 : f32 to vector<2x128xf32>
    %157 = arith.addf %156, %155 : vector<2x128xf32>
    %158 = arith.divf %156, %157 : vector<2x128xf32>
    %159 = math.tanh %153 : vector<2x128xf32>
    %160 = vector.extract_strided_slice %158 {offsets = [0, 0], sizes = [2, 32], strides = [1, 1]} : vector<2x128xf32> to vector<2x32xf32>
    %161 = vector.extract_strided_slice %158 {offsets = [0, 32], sizes = [2, 32], strides = [1, 1]} : vector<2x128xf32> to vector<2x32xf32>
    %162 = vector.extract_strided_slice %159 {offsets = [0, 64], sizes = [2, 32], strides = [1, 1]} : vector<2x128xf32> to vector<2x32xf32>
    %163 = vector.extract_strided_slice %158 {offsets = [0, 96], sizes = [2, 32], strides = [1, 1]} : vector<2x128xf32> to vector<2x32xf32>
    %164 = arith.mulf %161, %144 : vector<2x32xf32>
    %165 = arith.mulf %160, %162 : vector<2x32xf32>
    %166 = arith.addf %164, %165 : vector<2x32xf32>
    %167 = math.tanh %166 : vector<2x32xf32>
    %168 = arith.mulf %163, %167 : vector<2x32xf32>
    %c0_45 = arith.constant 0 : index
    %c6 = arith.constant 6 : index
    %c0_46 = arith.constant 0 : index
    %169 = vector.load %arg14[%c0_45, %c6, %c0_46] : memref<2x8x32xf32, #tpu.memory_space<vmem>>, vector<2x1x32xf32>
    %170 = vector.shape_cast %169 : vector<2x1x32xf32> to vector<2x32xf32>
    %171 = vector.shape_cast %168 : vector<2x32xf32> to vector<2x1x32xf32>
    tpu.vector_store %arg14[%c0_45, %c6, %c0_46], %171 {strides = array<i32>} : memref<2x8x32xf32, #tpu.memory_space<vmem>>, vector<2x1x32xf32>,
    %172 = vector.extract_strided_slice %14 {offsets = [0, 7, 0], sizes = [2, 1, 128], strides = [1, 1, 1]} : vector<2x8x128xf32> to vector<2x1x128xf32>
    %173 = vector.shape_cast %172 : vector<2x1x128xf32> to vector<2x128xf32>
    %cst_47 = arith.constant dense<0.000000e+00> : vector<2x128xf32>
    %174 = tpu.matmul %168, %15, %cst_47 {dimension_numbers = #tpu.dot_dimension_numbers<[1], [0], [0], [1], [0, 0, 1, 1], [], []>} : vector<2x32xf32>, vector<32x128xf32>, vector<2x128xf32> -> vector<2x128xf32>
    %175 = arith.addf %173, %174 : vector<2x128xf32>
    %176 = arith.negf %175 : vector<2x128xf32>
    %177 = math.exp %176 : vector<2x128xf32>
    %cst_48 = arith.constant 1.000000e+00 : f32
    %178 = vector.broadcast %cst_48 : f32 to vector<2x128xf32>
    %179 = arith.addf %178, %177 : vector<2x128xf32>
    %180 = arith.divf %178, %179 : vector<2x128xf32>
    %181 = math.tanh %175 : vector<2x128xf32>
    %182 = vector.extract_strided_slice %180 {offsets = [0, 0], sizes = [2, 32], strides = [1, 1]} : vector<2x128xf32> to vector<2x32xf32>
    %183 = vector.extract_strided_slice %180 {offsets = [0, 32], sizes = [2, 32], strides = [1, 1]} : vector<2x128xf32> to vector<2x32xf32>
    %184 = vector.extract_strided_slice %181 {offsets = [0, 64], sizes = [2, 32], strides = [1, 1]} : vector<2x128xf32> to vector<2x32xf32>
    %185 = vector.extract_strided_slice %180 {offsets = [0, 96], sizes = [2, 32], strides = [1, 1]} : vector<2x128xf32> to vector<2x32xf32>
    %186 = arith.mulf %183, %166 : vector<2x32xf32>
    %187 = arith.mulf %182, %184 : vector<2x32xf32>
    %188 = arith.addf %186, %187 : vector<2x32xf32>
    %189 = math.tanh %188 : vector<2x32xf32>
    %190 = arith.mulf %185, %189 : vector<2x32xf32>
    %c0_49 = arith.constant 0 : index
    %c7 = arith.constant 7 : index
    %c0_50 = arith.constant 0 : index
    %191 = vector.load %arg14[%c0_49, %c7, %c0_50] : memref<2x8x32xf32, #tpu.memory_space<vmem>>, vector<2x1x32xf32>
    %192 = vector.shape_cast %191 : vector<2x1x32xf32> to vector<2x32xf32>
    %193 = vector.shape_cast %190 : vector<2x32xf32> to vector<2x1x32xf32>
    tpu.vector_store %arg14[%c0_49, %c7, %c0_50], %193 {strides = array<i32>} : memref<2x8x32xf32, #tpu.memory_space<vmem>>, vector<2x1x32xf32>,
    %c0_51 = arith.constant 0 : index
    %c0_52 = arith.constant 0 : index
    %194 = vector.load %arg12[%c0_51, %c0_52] : memref<2x32xf32, #tpu.memory_space<vmem>>, vector<2x32xf32>
    tpu.vector_store %arg12[%c0_51, %c0_52], %190 {strides = array<i32>} : memref<2x32xf32, #tpu.memory_space<vmem>>, vector<2x32xf32>,
    %c0_53 = arith.constant 0 : index
    %c0_54 = arith.constant 0 : index
    %195 = vector.load %arg13[%c0_53, %c0_54] : memref<2x32xf32, #tpu.memory_space<vmem>>, vector<2x32xf32>
    tpu.vector_store %arg13[%c0_53, %c0_54], %188 {strides = array<i32>} : memref<2x32xf32, #tpu.memory_space<vmem>>, vector<2x32xf32>,
    %c0_55 = arith.constant 0 : index
    %c0_56 = arith.constant 0 : index
    %c0_57 = arith.constant 0 : index
    %196 = vector.load %arg14[%c0_55, %c0_56, %c0_57] : memref<2x8x32xf32, #tpu.memory_space<vmem>>, vector<2x8x32xf32>
    %197 = vector.shape_cast %196 : vector<2x8x32xf32> to vector<16x32xf32>
    %c0_58 = arith.constant 0 : index
    %c0_59 = arith.constant 0 : index
    %198 = vector.load %arg6[%c0_58, %c0_59] : memref<32x16xf32, #tpu.memory_space<vmem>>, vector<32x16xf32>
    %cst_60 = arith.constant dense<0.000000e+00> : vector<16x16xf32>
    %199 = tpu.matmul %197, %198, %cst_60 {dimension_numbers = #tpu.dot_dimension_numbers<[1], [0], [0], [1], [0, 0, 1, 1], [], []>} : vector<16x32xf32>, vector<32x16xf32>, vector<16x16xf32> -> vector<16x16xf32>
    %c0_61 = arith.constant 0 : index
    %c0_62 = arith.constant 0 : index
    %200 = vector.load %arg7[%c0_61, %c0_62] : memref<1x16xf32, #tpu.memory_space<vmem>>, vector<1x16xf32>
    %201 = vector.broadcast %200 : vector<1x16xf32> to vector<16x16xf32>
    %202 = arith.addf %199, %201 : vector<16x16xf32>
    %203 = vector.shape_cast %202 : vector<16x16xf32> to vector<2x8x16xf32>
    %204 = vector.extract_strided_slice %203 {offsets = [0, 0, 0], sizes = [2, 8, 8], strides = [1, 1, 1]} : vector<2x8x16xf32> to vector<2x8x8xf32>
    %c0_63 = arith.constant 0 : index
    %c0_64 = arith.constant 0 : index
    %c0_65 = arith.constant 0 : index
    %205 = vector.load %arg10[%c0_63, %c0_64, %c0_65] : memref<2x8x8xf32, #tpu.memory_space<vmem>>, vector<2x8x8xf32>
    tpu.vector_store %arg10[%c0_63, %c0_64, %c0_65], %204 {strides = array<i32>} : memref<2x8x8xf32, #tpu.memory_space<vmem>>, vector<2x8x8xf32>,
    %206 = vector.extract_strided_slice %203 {offsets = [0, 0, 8], sizes = [2, 8, 8], strides = [1, 1, 1]} : vector<2x8x16xf32> to vector<2x8x8xf32>
    %cst_66 = arith.constant 5.000000e-01 : f32
    %207 = vector.broadcast %cst_66 : f32 to vector<2x8x8xf32>
    %208 = arith.mulf %207, %206 : vector<2x8x8xf32>
    %209 = math.exp %208 : vector<2x8x8xf32>
    %c0_67 = arith.constant 0 : index
    %c0_68 = arith.constant 0 : index
    %c0_69 = arith.constant 0 : index
    %210 = vector.load %arg11[%c0_67, %c0_68, %c0_69] : memref<2x8x8xf32, #tpu.memory_space<vmem>>, vector<2x8x8xf32>
    tpu.vector_store %arg11[%c0_67, %c0_68, %c0_69], %209 {strides = array<i32>} : memref<2x8x8xf32, #tpu.memory_space<vmem>>, vector<2x8x8xf32>,
    return
  }
}

</mosaic_0001>

<bundles_post_ra>
// kernel: tpu_custom_call.1
= control target key start
LH: loop header
LB: loop body
LE: loop exit
PB: predicated region body
PF: predicated region fallthrough
CT: control target
= control target key end

     0   :  { %19 = vsyncpa [#allocation4], 0  ;;  %s2164_s0 = inlined_call_operand.vmem [shape: f32[2,8,16], index: 0, kind: input, shape index: {}]   ;;  %s2165_s1 = inlined_call_operand.hbm [shape: f32[16,32], index: 1, kind: input, shape index: {}]   ;;  %s2166_s2 = inlined_call_operand.hbm [shape: f32[1,32], index: 2, kind: input, shape index: {}]   ;;  %s2167_s3 = inlined_call_operand.vmem [shape: f32[32,128], index: 3, kind: input, shape index: {}]   ;;  %s2168_s4 = inlined_call_operand.hbm [shape: f32[32,128], index: 4, kind: input, shape index: {}]   ;;  %s2169_s5 = inlined_call_operand.hbm [shape: f32[1,128], index: 5, kind: input, shape index: {}]   ;;  %s2170_s6 = inlined_call_operand.vmem [shape: f32[32,16], index: 6, kind: input, shape index: {}]   ;;  %s2171_s7 = inlined_call_operand.vmem [shape: f32[1,16], index: 7, kind: input, shape index: {}]   ;;  %s2172_s8 = inlined_call_operand.vmem [shape: f32[2,32], index: 8, kind: input, shape index: {}]   ;;  %s2173_s9 = inlined_call_operand.vmem [shape: f32[2,32], index: 9, kind: input, shape index: {}]   ;;  %s2174_s10 = inlined_call_operand.hbm [shape: f32[2,8,8], index: 10, kind: output, shape index: {0}]   ;;  %s2175_s11 = inlined_call_operand.hbm [shape: f32[2,8,8], index: 11, kind: output, shape index: {1}]   ;;  %s2176_s12 = inlined_call_operand.hbm [shape: f32[2,32], index: 12, kind: output, shape index: {2}]   ;;  %s2177_s13 = inlined_call_operand.hbm [shape: f32[2,32], index: 13, kind: output, shape index: {3}]  }
   0x1   :  { %20 = vsyncpa [#allocation7], 0 }
   0x2   :  { %21 = vsyncpa [#allocation10], 0 }
   0x3   :  { %22 = vsyncpa [#allocation5], 0 }
   0x4   :  { %23 = vsyncpa [#allocation13], 0  ;;  %s45_s27 = sshll.u32 %s2166_s2, 4  ;;  %s46_s27 = int_to_ptr.hbm [resolvable:$true] %s45_s27 }
   0x5   :  { %24 = vsyncpa [#allocation16], 0  ;;  %s1710_s28 = smov [#allocation6]   ;;  %s31_s15 = sshll.u32 %s2165_s1, 4  ;;  %s32_s15 = int_to_ptr.hbm [resolvable:$true] %s31_s15 }
   0x6   :  { %s47_s29 = sshll.u32 %s1710_s28, 4  ;;  %s1711_s16 = smov [#allocation3]   ;;  %s48_s29 = int_to_ptr.vmem [resolvable:$true] %s47_s29 }
   0x7   :  { %50 = dma.hbm_to_vmem [thread:$0]  %s46_s27, 16, %s48_s29, [#allocation7]  }
   0x8   :  { %s33_s17 = sshll.u32 %s1711_s16, 4  ;;  %s1712_s18 = smov 128   ;;  %s34_s17 = int_to_ptr.vmem [resolvable:$true] %s33_s17 }
   0x9   :  { %s1713_s19 = smov 8   ;;  %s57_s21 = sshll.u32 %s2168_s4, 4  ;;  %s58_s21 = int_to_ptr.hbm [resolvable:$true] %s57_s21 }
   0xa   :  { %39 = dma.hbm_to_vmem [thread:$0]  %s32_s15, 256, %s34_s17, [#allocation4], %s1712_s18, %s1712_s18, %s1713_s19  }
   0xb   :  { %s1714_s22 = smov [#allocation8]   ;;  %s71_s25 = sshll.u32 %s2169_s5, 4  ;;  %s72_s25 = int_to_ptr.hbm [resolvable:$true] %s71_s25 }
   0xc   :  { %s59_s23 = sshll.u32 %s1714_s22, 4  ;;  %s1715_s26 = smov [#allocation9]   ;;  %s60_s23 = int_to_ptr.vmem [resolvable:$true] %s59_s23 }
   0xd   :  { %65 = dma.hbm_to_vmem [thread:$0]  %s58_s21, 512, %s60_s23, [#allocation7], %s1712_s18, %s1712_s18, %s1713_s19  }
   0xe   :  { %s73_s27 = sshll.u32 %s1715_s26, 4  ;;  %s74_s27 = int_to_ptr.vmem [resolvable:$true] %s73_s27 }
   0xf   :  { %76 = dma.hbm_to_vmem [thread:$0]  %s72_s25, 16, %s74_s27, [#allocation10]  }
  0x10   :  { %1698 = dma.done.wait [#allocation4], 256  }
  0x11   :  { %1699 = vsyncadd [#allocation4], 4294967040 }
  0x12   :  { %1700 = dma.done.wait [#allocation7], 528  }
  0x13   :  { %1701 = vsyncadd [#allocation7], 4294966768 }
  0x14   :  { %1702 = dma.done.wait [#allocation10], 16  }
  0x15   :  { %1703 = vsyncadd [#allocation10], 4294967280  ;;  %v104_v0 = vld [vmem:[#allocation3 + $0x8] sm:$0xff]  ;;  %v103_v1 = vld [vmem:[#allocation3] sm:$0xff]  ;;  %vm109_vm0 = vcmask 130048   ;;  %vm149_vm1 = vcmask 261120  }
  0x16   :  { %130 = vmatpush.msra.mxu0 %v104_v0  ;;  %v101_v2 = vld [vmem:[%s2164_s0] sm:$0xff]  ;;  %1355 = vmatpush.msra.mxu1 %v104_v0  ;;  %v102_v3 = vld [vmem:[%s2164_s0 + $0x8] sm:$0xff]  ;;  %v1821_v5 = vld [vmem:[#allocation8 + $0x10] sm:$0xff]  ;;  %s1716_s23 = smov 32   ;;  %vm308_vm10 = vcmask 1041409   ;;  %s1261_s15 = sshll.u32 %s2174_s10, 4  ;;  %s1262_s15 = int_to_ptr.hbm [resolvable:$true] %s1261_s15 }
  0x17   :  { %v1818_v4 = vld [vmem:[#allocation8 + $0x18] sm:$0xff]  ;;  %v1827_v7 = vld [vmem:[#allocation8 + $0x8] sm:$0xff]  ;;  %v1839_v9 = vld [vmem:[#allocation8] sm:$0xff]  ;;  %s1718_s0 = smov [#allocation11]   ;;  %s1720_s17 = smov 96  }
  0x18   :  { %200 = vmatpush.msra.mxu2 %v1818_v4  ;;  %v144_v6 = vld [vmem:[%s2167_s3 + $0x18] sm:$0xff]  ;;  %326 = vmatpush.msra.mxu3 %v1818_v4  ;;  %v143_v8 = vld [vmem:[%s2167_s3 + $0x10] sm:$0xff]  ;;  %v183_v10 = vld [vmem:[%s2172_s8] sm:$0x3]  ;;  %s1259_s16 = sshll.u32 %s1718_s0, 4  ;;  %s1721_s10 = smov [#allocation12]   ;;  %s1260_s16 = int_to_ptr.vmem [resolvable:$true] %s1259_s16 }
  0x19   :  { %131 = vmatpush.msra.mxu0 %v103_v1  ;;  %1356 = vmatpush.msra.mxu1 %v103_v1  ;;  %v142_v11 = vld [vmem:[%s2167_s3 + $0x8] sm:$0xff]  ;;  %v141_v12 = vld [vmem:[%s2167_s3] sm:$0xff]  ;;  %s1272_s2 = sshll.u32 %s1721_s10, 4  ;;  %s1274_s22 = sshll.u32 %s2175_s11, 4  ;;  %s1273_s2 = int_to_ptr.vmem [resolvable:$true] %s1272_s2  ;;  %s1275_s22 = int_to_ptr.hbm [resolvable:$true] %s1274_s22 }
  0x1a   :  { %1325 = vmatmul.msk.f32.vlgmr.msra.gmra.mxu0 %vm109_vm0, %v101_v2  ;;  %1326 = vmatmul.msk.f32.vlgmr.msra.gmra.mxu1 %vm109_vm0, %v102_v3  ;;  %v184_v13 = vld [vmem:[%s2173_s9] sm:$0x3]  ;;  %v1372_v24 = vld [vmem:[#allocation9] ss:$0 sm:$0xff]  ;;  %s1717_s9 = smov 64   ;;  %s1722_s3 = smov [#allocation14]  }
  0x1b   :  { %201 = vmatpush.msra.mxu2 %v1821_v5  ;;  %168 = vmatpush.msrb.mxu1 %v144_v6  ;;  %v255_v14 = vrot.slane %v184_v13, 1  ;;  %v1371_v15 = vld [vmem:[#allocation6] ss:$0 sm:$0xff]  ;;  %s1286_s8 = sshll.u32 %s1722_s3, 4  ;;  %s1288_s1 = sshll.u32 %s2176_s12, 4  ;;  %s1287_s8 = int_to_ptr.vmem [resolvable:$true] %s1286_s8  ;;  %s1289_s1 = int_to_ptr.hbm [resolvable:$true] %s1288_s1 }
  0x1c   :  { %327 = vmatpush.msra.mxu3 %v1821_v5  ;;  %699 = vmatpush.msrb.mxu0 %v1818_v4  ;;  %s1723_s24 = smov [#allocation15]   ;;  %s1299_s27 = sshll.u32 %s2177_s13, 4  ;;  %s1300_s27 = int_to_ptr.hbm [resolvable:$true] %s1299_s27 }
  0x1d   :  { %202 = vmatpush.msra.mxu2 %v1827_v7  ;;  %169 = vmatpush.msrb.mxu1 %v143_v8  ;;  %s1297_s11 = sshll.u32 %s1723_s24, 4  ;;  %s1298_s11 = int_to_ptr.vmem [resolvable:$true] %s1297_s11 }
  0x1e   :  { %328 = vmatpush.msra.mxu3 %v1827_v7  ;;  %700 = vmatpush.msrb.mxu0 %v1821_v5 }
  0x1f   :  { %203 = vmatpush.msra.mxu2 %v1839_v9  ;;  %170 = vmatpush.msrb.mxu1 %v142_v11 }
  0x20   :  { %701 = vmatpush.msrb.mxu0 %v1827_v7  ;;  %329 = vmatpush.msra.mxu3 %v1839_v9 }
  0x21   :  { %1329 = vmatmul.msk.f32.vlgmr.msra.gmra.mxu2 %vm149_vm1, %v183_v10  ;;  %171 = vmatpush.msrb.mxu1 %v141_v12 }
  0x22   :  { %574 = vmatpush.msrb.mxu3 %v1818_v4  ;;  %449 = vmatpush.msrb.mxu2 %v1818_v4 }
  0x23   :  { %702 = vmatpush.msrb.mxu0 %v1839_v9  ;;  %824 = vmatpush.msra.mxu1 %v1818_v4 }
  0x24   :  { %575 = vmatpush.msrb.mxu3 %v1821_v5  ;;  %450 = vmatpush.msrb.mxu2 %v1821_v5 }
  0x25   :  { %825 = vmatpush.msra.mxu1 %v1821_v5  ;;  %258 = vrot.lane.b32.xlu1 %v255_v14, %s1716_s23 }
  0x26   :  { %576 = vmatpush.msrb.mxu3 %v1827_v7  ;;  %451 = vmatpush.msrb.mxu2 %v1827_v7 }
  0x27   :  { %826 = vmatpush.msra.mxu1 %v1827_v7 }
  0x28   :  { %577 = vmatpush.msrb.mxu3 %v1839_v9  ;;  %452 = vmatpush.msrb.mxu2 %v1839_v9 }
  0x29   :  { %827 = vmatpush.msra.mxu1 %v1839_v9 }
  0x2a   :  { %949 = vmatpush.msra.mxu2 %v1818_v4 }
  0x2c   :  { %950 = vmatpush.msra.mxu2 %v1821_v5 }
  0x2d   :  { %256 = vrot.lane.b32.xlu1 %v184_v13, %s1716_s23 }
  0x2e   :  { %951 = vmatpush.msra.mxu2 %v1827_v7 }
  0x30   :  { %952 = vmatpush.msra.mxu2 %v1839_v9 }
  0x97   :  { %v133_v16 = vpop.f32.mrf.mxu0  ;;  %v136_v18 = vpop.f32.mrf.mxu1 }
  0x98   :  { %v134_v17 = vadd.f32 %v1371_v15, %v133_v16  ;;  %v137_v20 = vadd.f32 %v1371_v15, %v136_v18  ;;  %v259_v63 = vpop.permute.xlu1 %258 }
  0x9a   :  { %v139_v19 = vmax.f32 %v134_v17, 0.0  ;;  %v140_v21 = vmax.f32 %v137_v20, 0.0 }
  0x9c   :  { %1327 = vmatmul.msk.f32.vlgmr.msrb.gmra.mxu1 %vm149_vm1, %v139_v19 }
  0xa0   :  { %v257_v3 = vpop.permute.xlu1 %256 }
  0xa4   :  { %1328 = vmatmul.msk.f32.gmra.mxu1 %vm149_vm1, %v140_v21  ;;  %v205_v23 = vpop.f32.mrf.mxu2 }
  0xa5   :  { %v209_v25 = vrot.slane %v205_v23, 1 }
 0x119   :  { %v173_v22 = vpop.f32.mrf.mxu1 }
 0x11a   :  { %v1880_v29 = vadd.f32 %v1372_v24, %v173_v22 }
 0x11c   :  { %v212_v30 = vadd.f32 %v205_v23, %v1880_v29 }
 0x11e   :  { %v1330_v34 = vmul.f32 -1.442695, %v212_v30 }
 0x121   :  { %v176_v26 = vpop.f32.mrf.mxu1 }
 0x122   :  { %v1877_v27 = vadd.f32 %v1372_v24, %v176_v26 }
 0x124   :  { %v213_v28 = vadd.f32 %v209_v25, %v1877_v27 }
 0x126   :  { %1374 = vtanh.f32 %v213_v28  ;;  %v1331_v33 = vmul.f32 -1.442695, %v213_v28 }
 0x127   :  { %1376 = vtanh.f32 %v212_v30 }
 0x128   :  { %1378 = vpow2.f32 %v1331_v33 }
 0x129   :  { %1380 = vpow2.f32 %v1330_v34 }
 0x12c   :  { %v1375_v31 = vpop.eup %1374 }
 0x12d   :  { %268 = vrot.lane.b32.xlu0 %v1375_v31, %s1717_s9  ;;  %v1377_v32 = vpop.eup %1376 }
 0x12e   :  { %v1379_v35 = vpop.eup %1378 }
 0x12f   :  { %v221_v36 = vadd.f32 1.0, %v1379_v35  ;;  %v1381_v37 = vpop.eup %1380 }
 0x130   :  { %v220_v38 = vadd.f32 1.0, %v1381_v37 }
 0x131   :  { %1382 = vrcp.f32 %v221_v36  ;;  %v248_v47 = vand.u32 2147483648, %v221_v36  ;;  %vm242_vm3 = vweird.f32 %v221_v36  ;;  %v246_v48 = vand.u32 2147483647, %v221_v36 }
 0x132   :  { %1384 = vrcp.f32 %v220_v38  ;;  %v233_v56 = vand.u32 2147483648, %v220_v38  ;;  %vm227_vm7 = vweird.f32 %v220_v38  ;;  %v231_v57 = vand.u32 2147483647, %v220_v38 }
 0x133   :  { %v249_v51 = vor.u32 1.1754944e-38, %v248_v47  ;;  %vm247_vm5 = vcmp.eq.f32.partialorder %v246_v48, 8.507059e+37 }
 0x134   :  { %v234_v59 = vor.u32 1.1754944e-38, %v233_v56  ;;  %vm232_vm9 = vcmp.eq.f32.partialorder %v231_v57, 8.507059e+37 }
 0x135   :  { %266 = vrot.lane.b32.xlu0 %v1377_v32, %s1717_s9 }
 0x137   :  { %v1383_v39 = vpop.eup %1382 }
 0x138   :  { %v238_v40 = vmul.f32 %v1383_v39, %v221_v36  ;;  %v1385_v42 = vpop.eup %1384  ;;  %vm243_vm2 = vweird.f32 %v1383_v39 }
 0x139   :  { %v223_v44 = vmul.f32 %v1385_v42, %v220_v38  ;;  %vm244_vm4 = vmor %vm242_vm3, %vm243_vm2  ;;  %vm228_vm6 = vweird.f32 %v1385_v42 }
 0x13a   :  { %v239_v41 = vsub.f32 1.0, %v238_v40  ;;  %vm229_vm8 = vmor %vm227_vm7, %vm228_vm6 }
 0x13b   :  { %v224_v46 = vsub.f32 1.0, %v223_v44 }
 0x13c   :  { %v240_v43 = vmul.f32 %v1383_v39, %v239_v41 }
 0x13d   :  { %v225_v50 = vmul.f32 %v1385_v42, %v224_v46 }
 0x13e   :  { %v241_v45 = vadd.f32 %v1383_v39, %v240_v43 }
 0x13f   :  { %v226_v54 = vadd.f32 %v1385_v42, %v225_v50 }
 0x140   :  { %v245_v49 = vsel %vm244_vm4, %v1383_v39, %v241_v45 }
 0x141   :  { %v250_v52 = vsel %vm247_vm5, %v249_v51, %v245_v49  ;;  %v230_v58 = vsel %vm229_vm8, %v1385_v42, %v226_v54 }
 0x142   :  { %v235_v60 = vsel %vm232_vm9, %v234_v59, %v230_v58  ;;  %v263_v0 = vmul.f32 %v259_v63, %v250_v52 }
 0x143   :  { %v262_v6 = vmul.f32 %v257_v3, %v235_v60 }
 0x19f   :  { %v269_v53 = vpop.permute.xlu0 %268 }
 0x1a0   :  { %v273_v55 = vmul.f32 %v269_v53, %v250_v52 }
 0x1a2   :  { %278 = vrot.lane.b32.xlu2 %v273_v55, %s1716_s23 }
 0x1a7   :  { %v267_v61 = vpop.permute.xlu0 %266 }
 0x1a8   :  { %v272_v62 = vmul.f32 %v267_v61, %v235_v60 }
 0x1aa   :  { %276 = vrot.lane.b32.xlu2 %v272_v62, %s1716_s23 }
 0x1fc   :  { %v279_v1 = vpop.permute.xlu2 %278 }
 0x1fd   :  { %v1887_v2 = vadd.f32 %v279_v1, %v263_v0 }
 0x1ff   :  { %1386 = vtanh.f32 %v1887_v2  ;;  %v383_v59 = vrot.slane %v1887_v2, 7 }
 0x204   :  { %v277_v8 = vpop.permute.xlu2 %276 }
 0x205   :  { %v1387_v10 = vpop.eup %1386  ;;  %v1890_v11 = vadd.f32 %v277_v8, %v262_v6 }
 0x206   :  { %290 = vrot.lane.b32.xlu0 %v1387_v10, %s1717_s9 }
 0x207   :  { %1388 = vtanh.f32 %v1890_v11  ;;  %v382_v54 = vrot.slane %v1890_v11, 7 }
 0x20d   :  { %v1389_v12 = vpop.eup %1388 }
 0x20e   :  { %288 = vrot.lane.b32.xlu1 %v1389_v12, %s1717_s9 }
 0x278   :  { %v291_v13 = vpop.permute.xlu0 %290 }
 0x279   :  { %v1895_v14 = vmul.f32 %v291_v13, %v250_v52 }
 0x27b   :  { %v307_v16 = vrot.slane %v1895_v14, 7 }
 0x280   :  { %v289_v15 = vpop.permute.xlu1 %288 }
 0x281   :  { %v1898_v17 = vmul.f32 %v289_v15, %v235_v60 }
 0x283   :  { %v309_v18 = vsel %vm308_vm10, %v307_v16, %v1898_v17 }
 0x284   :  { %310 = vrot.lane.b32.xlu2 %v309_v18, %s1716_s23 }
 0x2de   :  { %v311_v19 = vpop.permute.xlu2 %310 }
 0x2df   :  { %1332 = vmatmul.msk.f32.vlgmr.msra.gmra.mxu3 %vm149_vm1, %v311_v19 }
 0x2e0   :  { %1074 = vmatpush.msra.mxu3 %v1818_v4 }
 0x2e2   :  { %1075 = vmatpush.msra.mxu3 %v1821_v5 }
 0x2e4   :  { %1076 = vmatpush.msra.mxu3 %v1827_v7 }
 0x2e6   :  { %1077 = vmatpush.msra.mxu3 %v1839_v9 }
 0x362   :  { %v331_v20 = vpop.f32.mrf.mxu3 }
 0x363   :  { %v335_v21 = vrot.slane %v331_v20, 7  ;;  %v339_v22 = vadd.f32 %v331_v20, %v1877_v27 }
 0x365   :  { %v338_v23 = vadd.f32 %v335_v21, %v1880_v29  ;;  %1390 = vtanh.f32 %v339_v22  ;;  %v1334_v4 = vmul.f32 -1.442695, %v339_v22 }
 0x367   :  { %1392 = vtanh.f32 %v338_v23  ;;  %v1333_v5 = vmul.f32 -1.442695, %v338_v23 }
 0x368   :  { %1394 = vpow2.f32 %v1334_v4 }
 0x369   :  { %1396 = vpow2.f32 %v1333_v5 }
 0x36b   :  { %v1391_v24 = vpop.eup %1390 }
 0x36c   :  { %392 = vrot.lane.b32.xlu1 %v1391_v24, %s1717_s9 }
 0x36d   :  { %v1393_v25 = vpop.eup %1392 }
 0x36e   :  { %390 = vrot.lane.b32.xlu0 %v1393_v25, %s1717_s9  ;;  %v1395_v7 = vpop.eup %1394 }
 0x36f   :  { %v1397_v9 = vpop.eup %1396  ;;  %v347_v26 = vadd.f32 1.0, %v1395_v7 }
 0x370   :  { %v346_v28 = vadd.f32 1.0, %v1397_v9 }
 0x371   :  { %1398 = vrcp.f32 %v347_v26  ;;  %v374_v39 = vand.u32 2147483648, %v347_v26  ;;  %vm368_vm12 = vweird.f32 %v347_v26  ;;  %v372_v40 = vand.u32 2147483647, %v347_v26 }
 0x372   :  { %1400 = vrcp.f32 %v346_v28  ;;  %v359_v43 = vand.u32 2147483648, %v346_v28  ;;  %vm353_vm15 = vweird.f32 %v346_v28  ;;  %v357_v45 = vand.u32 2147483647, %v346_v28 }
 0x373   :  { %v375_v44 = vor.u32 1.1754944e-38, %v374_v39  ;;  %vm373_vm0 = vcmp.eq.f32.partialorder %v372_v40, 8.507059e+37 }
 0x374   :  { %v360_v50 = vor.u32 1.1754944e-38, %v359_v43  ;;  %vm358_vm3 = vcmp.eq.f32.partialorder %v357_v45, 8.507059e+37 }
 0x377   :  { %v1399_v30 = vpop.eup %1398 }
 0x378   :  { %v1401_v31 = vpop.eup %1400  ;;  %v364_v32 = vmul.f32 %v1399_v30, %v347_v26  ;;  %vm369_vm11 = vweird.f32 %v1399_v30 }
 0x379   :  { %v349_v33 = vmul.f32 %v1401_v31, %v346_v28  ;;  %vm370_vm13 = vmor %vm368_vm12, %vm369_vm11  ;;  %vm354_vm14 = vweird.f32 %v1401_v31 }
 0x37a   :  { %v365_v34 = vsub.f32 1.0, %v364_v32  ;;  %vm355_vm2 = vmor %vm353_vm15, %vm354_vm14 }
 0x37b   :  { %v350_v35 = vsub.f32 1.0, %v349_v33 }
 0x37c   :  { %v366_v36 = vmul.f32 %v1399_v30, %v365_v34 }
 0x37d   :  { %v351_v37 = vmul.f32 %v1401_v31, %v350_v35 }
 0x37e   :  { %v367_v38 = vadd.f32 %v1399_v30, %v366_v36 }
 0x37f   :  { %v352_v41 = vadd.f32 %v1401_v31, %v351_v37 }
 0x380   :  { %v371_v42 = vsel %vm370_vm13, %v1399_v30, %v367_v38 }
 0x381   :  { %v376_v47 = vsel %vm373_vm0, %v375_v44, %v371_v42  ;;  %v356_v48 = vsel %vm355_vm2, %v1401_v31, %v352_v41 }
 0x382   :  { %v361_v52 = vsel %vm358_vm3, %v360_v50, %v356_v48  ;;  %v387_v60 = vmul.f32 %v383_v59, %v376_v47 }
 0x383   :  { %v386_v55 = vmul.f32 %v382_v54, %v361_v52 }
 0x3de   :  { %v393_v46 = vpop.permute.xlu1 %392 }
 0x3df   :  { %v397_v49 = vmul.f32 %v393_v46, %v376_v47 }
 0x3e0   :  { %v391_v51 = vpop.permute.xlu0 %390 }
 0x3e1   :  { %402 = vrot.lane.b32.xlu0 %v397_v49, %s1716_s23  ;;  %v396_v53 = vmul.f32 %v391_v51, %v361_v52 }
 0x3e3   :  { %400 = vrot.lane.b32.xlu2 %v396_v53, %s1716_s23 }
 0x43d   :  { %v401_v56 = vpop.permute.xlu2 %400 }
 0x43e   :  { %v1915_v57 = vadd.f32 %v401_v56, %v386_v55 }
 0x440   :  { %1402 = vtanh.f32 %v1915_v57  ;;  %v506_v53 = vrot.slane %v1915_v57, 7 }
 0x446   :  { %v1403_v58 = vpop.eup %1402 }
 0x447   :  { %412 = vrot.lane.b32.xlu1 %v1403_v58, %s1717_s9 }
 0x453   :  { %v403_v61 = vpop.permute.xlu0 %402 }
 0x454   :  { %v1920_v62 = vadd.f32 %v403_v61, %v387_v60 }
 0x456   :  { %1404 = vtanh.f32 %v1920_v62  ;;  %v507_v48 = vrot.slane %v1920_v62, 7 }
 0x45c   :  { %v1405_v63 = vpop.eup %1404 }
 0x45d   :  { %414 = vrot.lane.b32.xlu2 %v1405_v63, %s1717_s9 }
 0x4b7   :  { %v415_v0 = vpop.permute.xlu2 %414 }
 0x4b8   :  { %v1926_v6 = vmul.f32 %v415_v0, %v376_v47 }
 0x4b9   :  { %v413_v1 = vpop.permute.xlu1 %412 }
 0x4ba   :  { %v1924_v3 = vmul.f32 %v413_v1, %v361_v52 }
 0x4bc   :  { %v431_v8 = vrot.slane %v1924_v3, 1 }
 0x4be   :  { %v432_v2 = vsel %vm308_vm10, %v1926_v6, %v431_v8 }
 0x4bf   :  { %433 = vrot.lane.b32.xlu0 %v432_v2, %s1716_s23 }
 0x531   :  { %v434_v10 = vpop.permute.xlu0 %433 }
 0x532   :  { %1335 = vmatmul.msk.f32.vlgmr.msrb.gmra.mxu2 %vm149_vm1, %v434_v10 }
 0x5b5   :  { %v454_v11 = vpop.f32.mrf.mxu2 }
 0x5b6   :  { %v458_v12 = vrot.slane %v454_v11, 6  ;;  %v459_v13 = vrot.slane %v454_v11, 7 }
 0x5b8   :  { %v462_v15 = vadd.f32 %v458_v12, %v1880_v29  ;;  %v463_v16 = vadd.f32 %v459_v13, %v1877_v27 }
 0x5ba   :  { %1406 = vtanh.f32 %v462_v15  ;;  %v1337_v20 = vmul.f32 -1.442695, %v463_v16  ;;  %v1336_v24 = vmul.f32 -1.442695, %v462_v15 }
 0x5bb   :  { %1408 = vtanh.f32 %v463_v16 }
 0x5bc   :  { %1410 = vpow2.f32 %v1337_v20 }
 0x5c0   :  { %v1407_v18 = vpop.eup %1406 }
 0x5c1   :  { %v1409_v19 = vpop.eup %1408  ;;  %514 = vrot.lane.b32.xlu1 %v1407_v18, %s1717_s9 }
 0x5c2   :  { %516 = vrot.lane.b32.xlu2 %v1409_v19, %s1717_s9  ;;  %v1411_v21 = vpop.eup %1410 }
 0x5c3   :  { %v471_v22 = vadd.f32 1.0, %v1411_v21 }
 0x5c5   :  { %1412 = vrcp.f32 %v471_v22  ;;  %v498_v28 = vand.u32 2147483648, %v471_v22  ;;  %vm492_vm5 = vweird.f32 %v471_v22  ;;  %v496_v30 = vand.u32 2147483647, %v471_v22 }
 0x5c6   :  { %1414 = vpow2.f32 %v1336_v24 }
 0x5c7   :  { %v499_v32 = vor.u32 1.1754944e-38, %v498_v28  ;;  %vm497_vm7 = vcmp.eq.f32.partialorder %v496_v30, 8.507059e+37 }
 0x5cb   :  { %v1413_v23 = vpop.eup %1412 }
 0x5cc   :  { %v488_v25 = vmul.f32 %v1413_v23, %v471_v22  ;;  %v1415_v5 = vpop.eup %1414  ;;  %vm493_vm4 = vweird.f32 %v1413_v23 }
 0x5cd   :  { %v470_v9 = vadd.f32 1.0, %v1415_v5  ;;  %vm494_vm6 = vmor %vm492_vm5, %vm493_vm4 }
 0x5ce   :  { %v489_v4 = vsub.f32 1.0, %v488_v25 }
 0x5cf   :  { %1416 = vrcp.f32 %v470_v9  ;;  %v483_v41 = vand.u32 2147483648, %v470_v9  ;;  %vm477_vm9 = vweird.f32 %v470_v9  ;;  %v481_v42 = vand.u32 2147483647, %v470_v9 }
 0x5d0   :  { %v490_v7 = vmul.f32 %v1413_v23, %v489_v4 }
 0x5d1   :  { %v484_v44 = vor.u32 1.1754944e-38, %v483_v41  ;;  %vm482_vm12 = vcmp.eq.f32.partialorder %v481_v42, 8.507059e+37 }
 0x5d2   :  { %v491_v26 = vadd.f32 %v1413_v23, %v490_v7 }
 0x5d4   :  { %v495_v31 = vsel %vm494_vm6, %v1413_v23, %v491_v26 }
 0x5d5   :  { %v500_v34 = vsel %vm497_vm7, %v499_v32, %v495_v31  ;;  %v1417_v35 = vpop.eup %1416 }
 0x5d6   :  { %v473_v37 = vmul.f32 %v1417_v35, %v470_v9  ;;  %vm478_vm8 = vweird.f32 %v1417_v35  ;;  %v511_v49 = vmul.f32 %v507_v48, %v500_v34 }
 0x5d7   :  { %vm479_vm11 = vmor %vm477_vm9, %vm478_vm8 }
 0x5d8   :  { %v474_v38 = vsub.f32 1.0, %v473_v37 }
 0x5da   :  { %v475_v39 = vmul.f32 %v1417_v35, %v474_v38 }
 0x5dc   :  { %v476_v40 = vadd.f32 %v1417_v35, %v475_v39 }
 0x5de   :  { %v480_v43 = vsel %vm479_vm11, %v1417_v35, %v476_v40 }
 0x5df   :  { %v485_v46 = vsel %vm482_vm12, %v484_v44, %v480_v43 }
 0x5e0   :  { %v510_v54 = vmul.f32 %v506_v53, %v485_v46 }
 0x61c   :  { %v517_v33 = vpop.permute.xlu2 %516 }
 0x61d   :  { %v521_v36 = vmul.f32 %v517_v33, %v500_v34 }
 0x61f   :  { %526 = vrot.lane.b32.xlu1 %v521_v36, %s1716_s23 }
 0x633   :  { %v515_v45 = vpop.permute.xlu1 %514 }
 0x634   :  { %v520_v47 = vmul.f32 %v515_v45, %v485_v46 }
 0x636   :  { %524 = vrot.lane.b32.xlu0 %v520_v47, %s1716_s23 }
 0x691   :  { %v527_v50 = vpop.permute.xlu1 %526 }
 0x692   :  { %v1940_v51 = vadd.f32 %v527_v50, %v511_v49 }
 0x694   :  { %1418 = vtanh.f32 %v1940_v51 }
 0x69a   :  { %v1419_v52 = vpop.eup %1418 }
 0x69b   :  { %538 = vrot.lane.b32.xlu0 %v1419_v52, %s1717_s9 }
 0x6a8   :  { %v525_v55 = vpop.permute.xlu0 %524 }
 0x6a9   :  { %v1945_v56 = vadd.f32 %v525_v55, %v510_v54 }
 0x6ab   :  { %1420 = vtanh.f32 %v1945_v56  ;;  %v631_v45 = vrot.slane %v1945_v56, 7 }
 0x6b1   :  { %v1421_v58 = vpop.eup %1420 }
 0x6b2   :  { %536 = vrot.lane.b32.xlu2 %v1421_v58, %s1717_s9 }
 0x70c   :  { %v537_v59 = vpop.permute.xlu2 %536 }
 0x70d   :  { %v539_v60 = vpop.permute.xlu0 %538  ;;  %v1949_v61 = vmul.f32 %v537_v59, %v485_v46  ;;  %v632_v46 = vrot.slane %v1940_v51, 7 }
 0x70e   :  { %v1951_v62 = vmul.f32 %v539_v60, %v500_v34 }
 0x70f   :  { %v555_v63 = vrot.slane %v1949_v61, 2 }
 0x710   :  { %v556_v0 = vrot.slane %v1951_v62, 1 }
 0x712   :  { %v557_v57 = vsel %vm308_vm10, %v556_v0, %v555_v63 }
 0x713   :  { %558 = vrot.lane.b32.xlu1 %v557_v57, %s1716_s23 }
 0x785   :  { %v559_v1 = vpop.permute.xlu1 %558 }
 0x786   :  { %1338 = vmatmul.msk.f32.vlgmr.msrb.gmra.mxu3 %vm149_vm1, %v559_v1 }
 0x809   :  { %v579_v8 = vpop.f32.mrf.mxu3 }
 0x80a   :  { %v583_v2 = vrot.slane %v579_v8, 5  ;;  %v584_v10 = vrot.slane %v579_v8, 6 }
 0x80c   :  { %v587_v11 = vadd.f32 %v583_v2, %v1880_v29  ;;  %v588_v12 = vadd.f32 %v584_v10, %v1877_v27 }
 0x80e   :  { %1422 = vtanh.f32 %v587_v11  ;;  %v1339_v16 = vmul.f32 -1.442695, %v587_v11  ;;  %v1340_v21 = vmul.f32 -1.442695, %v588_v12 }
 0x80f   :  { %1424 = vtanh.f32 %v588_v12 }
 0x810   :  { %1426 = vpow2.f32 %v1339_v16 }
 0x814   :  { %v1423_v13 = vpop.eup %1422 }
 0x815   :  { %v1425_v15 = vpop.eup %1424  ;;  %639 = vrot.lane.b32.xlu2 %v1423_v13, %s1717_s9 }
 0x816   :  { %641 = vrot.lane.b32.xlu0 %v1425_v15, %s1717_s9  ;;  %v1427_v18 = vpop.eup %1426 }
 0x817   :  { %v595_v19 = vadd.f32 1.0, %v1427_v18 }
 0x819   :  { %1428 = vrcp.f32 %v595_v19  ;;  %v608_v7 = vand.u32 2147483648, %v595_v19  ;;  %vm602_vm14 = vweird.f32 %v595_v19  ;;  %v606_v9 = vand.u32 2147483647, %v595_v19 }
 0x81a   :  { %1430 = vpow2.f32 %v1340_v21 }
 0x81b   :  { %v609_v28 = vor.u32 1.1754944e-38, %v608_v7  ;;  %vm607_vm0 = vcmp.eq.f32.partialorder %v606_v9, 8.507059e+37 }
 0x81f   :  { %v1429_v20 = vpop.eup %1428 }
 0x820   :  { %v598_v22 = vmul.f32 %v1429_v20, %v595_v19  ;;  %v1431_v25 = vpop.eup %1430  ;;  %vm603_vm13 = vweird.f32 %v1429_v20 }
 0x821   :  { %v596_v4 = vadd.f32 1.0, %v1431_v25  ;;  %vm604_vm15 = vmor %vm602_vm14, %vm603_vm13 }
 0x822   :  { %v599_v23 = vsub.f32 1.0, %v598_v22 }
 0x823   :  { %1432 = vrcp.f32 %v596_v4  ;;  %v623_v38 = vand.u32 2147483648, %v596_v4  ;;  %vm617_vm3 = vweird.f32 %v596_v4  ;;  %v621_v39 = vand.u32 2147483647, %v596_v4 }
 0x824   :  { %v600_v24 = vmul.f32 %v1429_v20, %v599_v23 }
 0x825   :  { %v624_v41 = vor.u32 1.1754944e-38, %v623_v38  ;;  %vm622_vm5 = vcmp.eq.f32.partialorder %v621_v39, 8.507059e+37 }
 0x826   :  { %v601_v5 = vadd.f32 %v1429_v20, %v600_v24 }
 0x828   :  { %v605_v26 = vsel %vm604_vm15, %v1429_v20, %v601_v5 }
 0x829   :  { %v610_v31 = vsel %vm607_vm0, %v609_v28, %v605_v26  ;;  %v1433_v33 = vpop.eup %1432 }
 0x82a   :  { %v613_v34 = vmul.f32 %v1433_v33, %v596_v4  ;;  %vm618_vm2 = vweird.f32 %v1433_v33  ;;  %v635_v47 = vmul.f32 %v631_v45, %v610_v31 }
 0x82b   :  { %vm619_vm4 = vmor %vm617_vm3, %vm618_vm2 }
 0x82c   :  { %v614_v35 = vsub.f32 1.0, %v613_v34 }
 0x82e   :  { %v615_v36 = vmul.f32 %v1433_v33, %v614_v35 }
 0x830   :  { %v616_v37 = vadd.f32 %v1433_v33, %v615_v36 }
 0x832   :  { %v620_v40 = vsel %vm619_vm4, %v1433_v33, %v616_v37 }
 0x833   :  { %v625_v43 = vsel %vm622_vm5, %v624_v41, %v620_v40 }
 0x834   :  { %v636_v48 = vmul.f32 %v632_v46, %v625_v43 }
 0x86f   :  { %v640_v30 = vpop.permute.xlu2 %639 }
 0x870   :  { %v645_v32 = vmul.f32 %v640_v30, %v610_v31 }
 0x872   :  { %649 = vrot.lane.b32.xlu1 %v645_v32, %s1716_s23 }
 0x888   :  { %v642_v42 = vpop.permute.xlu0 %641 }
 0x889   :  { %v646_v44 = vmul.f32 %v642_v42, %v625_v43 }
 0x88b   :  { %651 = vrot.lane.b32.xlu2 %v646_v44, %s1716_s23 }
 0x8e4   :  { %v650_v49 = vpop.permute.xlu1 %649 }
 0x8e5   :  { %v652_v50 = vpop.permute.xlu2 %651  ;;  %v1966_v52 = vadd.f32 %v650_v49, %v635_v47 }
 0x8e6   :  { %v1968_v53 = vadd.f32 %v652_v50, %v636_v48 }
 0x8e7   :  { %1434 = vtanh.f32 %v1966_v52  ;;  %v756_v44 = vrot.slane %v1966_v52, 7 }
 0x8e8   :  { %1436 = vtanh.f32 %v1968_v53  ;;  %v757_v49 = vrot.slane %v1968_v53, 7 }
 0x8ed   :  { %v1435_v54 = vpop.eup %1434 }
 0x8ee   :  { %v1437_v55 = vpop.eup %1436  ;;  %661 = vrot.lane.b32.xlu0 %v1435_v54, %s1717_s9 }
 0x8ef   :  { %663 = vrot.lane.b32.xlu1 %v1437_v55, %s1717_s9 }
 0x960   :  { %v662_v56 = vpop.permute.xlu0 %661 }
 0x961   :  { %v664_v51 = vpop.permute.xlu1 %663  ;;  %v1974_v58 = vmul.f32 %v662_v56, %v610_v31 }
 0x962   :  { %v1976_v59 = vmul.f32 %v664_v51, %v625_v43 }
 0x963   :  { %v680_v60 = vrot.slane %v1974_v58, 3 }
 0x964   :  { %v681_v63 = vrot.slane %v1976_v59, 2 }
 0x966   :  { %v682_v0 = vsel %vm308_vm10, %v681_v63, %v680_v60 }
 0x967   :  { %683 = vrot.lane.b32.xlu2 %v682_v0, %s1716_s23 }
 0x9c1   :  { %v684_v57 = vpop.permute.xlu2 %683 }
 0x9c2   :  { %1341 = vmatmul.msk.f32.vlgmr.msrb.gmra.mxu0 %vm149_vm1, %v684_v57 }
 0xa3f   :  { %v704_v1 = vpop.f32.mrf.mxu0 }
 0xa40   :  { %v708_v8 = vrot.slane %v704_v1, 4  ;;  %v709_v2 = vrot.slane %v704_v1, 5 }
 0xa42   :  { %v712_v10 = vadd.f32 %v708_v8, %v1880_v29  ;;  %v713_v11 = vadd.f32 %v709_v2, %v1877_v27 }
 0xa44   :  { %1438 = vtanh.f32 %v712_v10  ;;  %v1342_v15 = vmul.f32 -1.442695, %v712_v10  ;;  %v1343_v16 = vmul.f32 -1.442695, %v713_v11 }
 0xa45   :  { %1440 = vtanh.f32 %v713_v11 }
 0xa46   :  { %1442 = vpow2.f32 %v1342_v15 }
 0xa47   :  { %1444 = vpow2.f32 %v1343_v16 }
 0xa4a   :  { %v1439_v12 = vpop.eup %1438 }
 0xa4b   :  { %v1441_v13 = vpop.eup %1440  ;;  %764 = vrot.lane.b32.xlu0 %v1439_v12, %s1717_s9 }
 0xa4c   :  { %766 = vrot.lane.b32.xlu1 %v1441_v13, %s1717_s9  ;;  %v1443_v18 = vpop.eup %1442 }
 0xa4d   :  { %v1445_v19 = vpop.eup %1444  ;;  %v720_v20 = vadd.f32 1.0, %v1443_v18 }
 0xa4e   :  { %v721_v21 = vadd.f32 1.0, %v1445_v19 }
 0xa4f   :  { %1446 = vrcp.f32 %v720_v20  ;;  %v733_v30 = vand.u32 2147483648, %v720_v20  ;;  %vm727_vm8 = vweird.f32 %v720_v20  ;;  %v731_v32 = vand.u32 2147483647, %v720_v20 }
 0xa50   :  { %1448 = vrcp.f32 %v721_v21  ;;  %v748_v31 = vand.u32 2147483648, %v721_v21  ;;  %vm742_vm9 = vweird.f32 %v721_v21  ;;  %v746_v33 = vand.u32 2147483647, %v721_v21 }
 0xa51   :  { %v734_v36 = vor.u32 1.1754944e-38, %v733_v30  ;;  %vm732_vm13 = vcmp.eq.f32.partialorder %v731_v32, 8.507059e+37 }
 0xa52   :  { %v749_v37 = vor.u32 1.1754944e-38, %v748_v31  ;;  %vm747_vm14 = vcmp.eq.f32.partialorder %v746_v33, 8.507059e+37 }
 0xa55   :  { %v1447_v22 = vpop.eup %1446 }
 0xa56   :  { %v1449_v23 = vpop.eup %1448  ;;  %v723_v24 = vmul.f32 %v1447_v22, %v720_v20  ;;  %vm728_vm6 = vweird.f32 %v1447_v22 }
 0xa57   :  { %v738_v25 = vmul.f32 %v1449_v23, %v721_v21  ;;  %vm743_vm7 = vweird.f32 %v1449_v23  ;;  %vm729_vm11 = vmor %vm727_vm8, %vm728_vm6 }
 0xa58   :  { %v724_v4 = vsub.f32 1.0, %v723_v24  ;;  %vm744_vm12 = vmor %vm742_vm9, %vm743_vm7 }
 0xa59   :  { %v739_v5 = vsub.f32 1.0, %v738_v25 }
 0xa5a   :  { %v725_v7 = vmul.f32 %v1447_v22, %v724_v4 }
 0xa5b   :  { %v740_v9 = vmul.f32 %v1449_v23, %v739_v5 }
 0xa5c   :  { %v726_v26 = vadd.f32 %v1447_v22, %v725_v7 }
 0xa5d   :  { %v741_v28 = vadd.f32 %v1449_v23, %v740_v9 }
 0xa5e   :  { %v730_v34 = vsel %vm729_vm11, %v1447_v22, %v726_v26 }
 0xa5f   :  { %v745_v35 = vsel %vm744_vm12, %v1449_v23, %v741_v28  ;;  %v735_v39 = vsel %vm732_vm13, %v734_v36, %v730_v34 }
 0xa60   :  { %v750_v41 = vsel %vm747_vm14, %v749_v37, %v745_v35  ;;  %v760_v45 = vmul.f32 %v756_v44, %v735_v39 }
 0xa61   :  { %v761_v50 = vmul.f32 %v757_v49, %v750_v41 }
 0xabd   :  { %v765_v38 = vpop.permute.xlu0 %764 }
 0xabe   :  { %v767_v40 = vpop.permute.xlu1 %766  ;;  %v770_v42 = vmul.f32 %v765_v38, %v735_v39 }
 0xabf   :  { %v771_v43 = vmul.f32 %v767_v40, %v750_v41 }
 0xac0   :  { %774 = vrot.lane.b32.xlu2 %v770_v42, %s1716_s23 }
 0xac1   :  { %776 = vrot.lane.b32.xlu0 %v771_v43, %s1716_s23 }
 0xb1a   :  { %v775_v46 = vpop.permute.xlu2 %774 }
 0xb1b   :  { %v1990_v47 = vadd.f32 %v775_v46, %v760_v45 }
 0xb1d   :  { %1450 = vtanh.f32 %v1990_v47 }
 0xb23   :  { %v1451_v48 = vpop.eup %1450 }
 0xb24   :  { %786 = vrot.lane.b32.xlu1 %v1451_v48, %s1717_s9 }
 0xb33   :  { %v777_v54 = vpop.permute.xlu0 %776 }
 0xb34   :  { %v1995_v55 = vadd.f32 %v777_v54, %v761_v50  ;;  %v881_v54 = vrot.slane %v1990_v47, 7 }
 0xb36   :  { %1452 = vtanh.f32 %v1995_v55  ;;  %v882_v45 = vrot.slane %v1995_v55, 7 }
 0xb3c   :  { %v1453_v56 = vpop.eup %1452 }
 0xb3d   :  { %788 = vrot.lane.b32.xlu2 %v1453_v56, %s1717_s9 }
 0xb96   :  { %v787_v52 = vpop.permute.xlu1 %786 }
 0xb97   :  { %v789_v51 = vpop.permute.xlu2 %788  ;;  %v1999_v60 = vmul.f32 %v787_v52, %v735_v39 }
 0xb98   :  { %v2001_v63 = vmul.f32 %v789_v51, %v750_v41 }
 0xb99   :  { %v805_v0 = vrot.slane %v1999_v60, 4 }
 0xb9a   :  { %v806_v57 = vrot.slane %v2001_v63, 3 }
 0xb9c   :  { %v807_v53 = vsel %vm308_vm10, %v806_v57, %v805_v0 }
 0xb9d   :  { %808 = vrot.lane.b32.xlu0 %v807_v53, %s1716_s23 }
 0xc0f   :  { %v809_v1 = vpop.permute.xlu0 %808 }
 0xc10   :  { %1344 = vmatmul.msk.f32.vlgmr.msra.gmra.mxu1 %vm149_vm1, %v809_v1 }
 0xc8d   :  { %v829_v8 = vpop.f32.mrf.mxu1 }
 0xc8e   :  { %v833_v2 = vrot.slane %v829_v8, 3  ;;  %v834_v10 = vrot.slane %v829_v8, 4 }
 0xc90   :  { %v837_v11 = vadd.f32 %v833_v2, %v1880_v29  ;;  %v838_v12 = vadd.f32 %v834_v10, %v1877_v27 }
 0xc92   :  { %1454 = vtanh.f32 %v837_v11  ;;  %v1346_v16 = vmul.f32 -1.442695, %v838_v12  ;;  %v1345_v21 = vmul.f32 -1.442695, %v837_v11 }
 0xc93   :  { %1456 = vtanh.f32 %v838_v12 }
 0xc94   :  { %1458 = vpow2.f32 %v1346_v16 }
 0xc98   :  { %v1455_v13 = vpop.eup %1454 }
 0xc99   :  { %v1457_v15 = vpop.eup %1456  ;;  %889 = vrot.lane.b32.xlu1 %v1455_v13, %s1717_s9 }
 0xc9a   :  { %891 = vrot.lane.b32.xlu2 %v1457_v15, %s1717_s9  ;;  %v1459_v18 = vpop.eup %1458 }
 0xc9b   :  { %v846_v19 = vadd.f32 1.0, %v1459_v18 }
 0xc9d   :  { %1460 = vrcp.f32 %v846_v19  ;;  %v873_v7 = vand.u32 2147483648, %v846_v19  ;;  %vm867_vm0 = vweird.f32 %v846_v19  ;;  %v871_v9 = vand.u32 2147483647, %v846_v19 }
 0xc9e   :  { %1462 = vpow2.f32 %v1345_v21 }
 0xc9f   :  { %v874_v28 = vor.u32 1.1754944e-38, %v873_v7  ;;  %vm872_vm3 = vcmp.eq.f32.partialorder %v871_v9, 8.507059e+37 }
 0xca3   :  { %v1461_v20 = vpop.eup %1460 }
 0xca4   :  { %v863_v22 = vmul.f32 %v1461_v20, %v846_v19  ;;  %v1463_v24 = vpop.eup %1462  ;;  %vm868_vm15 = vweird.f32 %v1461_v20 }
 0xca5   :  { %v845_v4 = vadd.f32 1.0, %v1463_v24  ;;  %vm869_vm2 = vmor %vm867_vm0, %vm868_vm15 }
 0xca6   :  { %v864_v23 = vsub.f32 1.0, %v863_v22 }
 0xca7   :  { %1464 = vrcp.f32 %v845_v4  ;;  %v858_v38 = vand.u32 2147483648, %v845_v4  ;;  %vm852_vm5 = vweird.f32 %v845_v4  ;;  %v856_v39 = vand.u32 2147483647, %v845_v4 }
 0xca8   :  { %v865_v25 = vmul.f32 %v1461_v20, %v864_v23 }
 0xca9   :  { %v859_v41 = vor.u32 1.1754944e-38, %v858_v38  ;;  %vm857_vm7 = vcmp.eq.f32.partialorder %v856_v39, 8.507059e+37 }
 0xcaa   :  { %v866_v5 = vadd.f32 %v1461_v20, %v865_v25 }
 0xcac   :  { %v870_v26 = vsel %vm869_vm2, %v1461_v20, %v866_v5 }
 0xcad   :  { %v875_v31 = vsel %vm872_vm3, %v874_v28, %v870_v26  ;;  %v1465_v32 = vpop.eup %1464 }
 0xcae   :  { %v848_v34 = vmul.f32 %v1465_v32, %v845_v4  ;;  %vm853_vm4 = vweird.f32 %v1465_v32  ;;  %v886_v46 = vmul.f32 %v882_v45, %v875_v31 }
 0xcaf   :  { %vm854_vm6 = vmor %vm852_vm5, %vm853_vm4 }
 0xcb0   :  { %v849_v35 = vsub.f32 1.0, %v848_v34 }
 0xcb2   :  { %v850_v36 = vmul.f32 %v1465_v32, %v849_v35 }
 0xcb4   :  { %v851_v37 = vadd.f32 %v1465_v32, %v850_v36 }
 0xcb6   :  { %v855_v40 = vsel %vm854_vm6, %v1465_v32, %v851_v37 }
 0xcb7   :  { %v860_v43 = vsel %vm857_vm7, %v859_v41, %v855_v40 }
 0xcb8   :  { %v885_v56 = vmul.f32 %v881_v54, %v860_v43 }
 0xcf4   :  { %v892_v30 = vpop.permute.xlu2 %891 }
 0xcf5   :  { %v896_v33 = vmul.f32 %v892_v30, %v875_v31 }
 0xcf7   :  { %901 = vrot.lane.b32.xlu1 %v896_v33, %s1716_s23 }
 0xd0b   :  { %v890_v42 = vpop.permute.xlu1 %889 }
 0xd0c   :  { %v895_v44 = vmul.f32 %v890_v42, %v860_v43 }
 0xd0e   :  { %899 = vrot.lane.b32.xlu0 %v895_v44, %s1716_s23 }
 0xd69   :  { %v902_v48 = vpop.permute.xlu1 %901 }
 0xd6a   :  { %v2015_v49 = vadd.f32 %v902_v48, %v886_v46 }
 0xd6c   :  { %1466 = vtanh.f32 %v2015_v49  ;;  %v1007_v54 = vrot.slane %v2015_v49, 7 }
 0xd72   :  { %v1467_v50 = vpop.eup %1466 }
 0xd73   :  { %913 = vrot.lane.b32.xlu0 %v1467_v50, %s1717_s9 }
 0xd80   :  { %v900_v52 = vpop.permute.xlu0 %899 }
 0xd81   :  { %v2020_v51 = vadd.f32 %v900_v52, %v885_v56 }
 0xd83   :  { %1468 = vtanh.f32 %v2020_v51  ;;  %v1006_v50 = vrot.slane %v2020_v51, 7 }
 0xd89   :  { %v1469_v0 = vpop.eup %1468 }
 0xd8a   :  { %911 = vrot.lane.b32.xlu2 %v1469_v0, %s1717_s9 }
 0xde4   :  { %v912_v55 = vpop.permute.xlu2 %911 }
 0xde5   :  { %v914_v57 = vpop.permute.xlu0 %913  ;;  %v2024_v53 = vmul.f32 %v912_v55, %v860_v43 }
 0xde6   :  { %v2026_v1 = vmul.f32 %v914_v57, %v875_v31 }
 0xde7   :  { %v930_v8 = vrot.slane %v2024_v53, 5 }
 0xde8   :  { %v931_v2 = vrot.slane %v2026_v1, 4 }
 0xdea   :  { %v932_v47 = vsel %vm308_vm10, %v931_v2, %v930_v8 }
 0xdeb   :  { %933 = vrot.lane.b32.xlu1 %v932_v47, %s1716_s23 }
 0xe5d   :  { %v934_v10 = vpop.permute.xlu1 %933 }
 0xe5e   :  { %1347 = vmatmul.msk.f32.vlgmr.msra.gmra.mxu2 %vm149_vm1, %v934_v10 }
 0xee1   :  { %v954_v11 = vpop.f32.mrf.mxu2 }
 0xee2   :  { %v958_v12 = vrot.slane %v954_v11, 2  ;;  %v959_v13 = vrot.slane %v954_v11, 3 }
 0xee4   :  { %v962_v15 = vadd.f32 %v958_v12, %v1880_v29  ;;  %v963_v16 = vadd.f32 %v959_v13, %v1877_v27 }
 0xee6   :  { %1470 = vtanh.f32 %v962_v15  ;;  %v1348_v20 = vmul.f32 -1.442695, %v962_v15  ;;  %v1349_v24 = vmul.f32 -1.442695, %v963_v16 }
 0xee7   :  { %1472 = vtanh.f32 %v963_v16 }
 0xee8   :  { %1474 = vpow2.f32 %v1348_v20 }
 0xeec   :  { %v1471_v18 = vpop.eup %1470 }
 0xeed   :  { %v1473_v19 = vpop.eup %1472  ;;  %1014 = vrot.lane.b32.xlu2 %v1471_v18, %s1717_s9 }
 0xeee   :  { %1016 = vrot.lane.b32.xlu0 %v1473_v19, %s1717_s9  ;;  %v1475_v21 = vpop.eup %1474 }
 0xeef   :  { %v970_v22 = vadd.f32 1.0, %v1475_v21 }
 0xef1   :  { %1476 = vrcp.f32 %v970_v22  ;;  %v983_v28 = vand.u32 2147483648, %v970_v22  ;;  %vm977_vm9 = vweird.f32 %v970_v22  ;;  %v981_v30 = vand.u32 2147483647, %v970_v22 }
 0xef2   :  { %1478 = vpow2.f32 %v1349_v24 }
 0xef3   :  { %v984_v32 = vor.u32 1.1754944e-38, %v983_v28  ;;  %vm982_vm12 = vcmp.eq.f32.partialorder %v981_v30, 8.507059e+37 }
 0xef7   :  { %v1477_v23 = vpop.eup %1476 }
 0xef8   :  { %v973_v25 = vmul.f32 %v1477_v23, %v970_v22  ;;  %v1479_v7 = vpop.eup %1478  ;;  %vm978_vm8 = vweird.f32 %v1477_v23 }
 0xef9   :  { %v971_v9 = vadd.f32 1.0, %v1479_v7  ;;  %vm979_vm11 = vmor %vm977_vm9, %vm978_vm8  ;;  %vm304_vm9 = vcmask 253952  }
 0xefa   :  { %v974_v4 = vsub.f32 1.0, %v973_v25 }
 0xefb   :  { %1480 = vrcp.f32 %v971_v9  ;;  %v998_v41 = vand.u32 2147483648, %v971_v9  ;;  %vm992_vm14 = vweird.f32 %v971_v9  ;;  %v996_v42 = vand.u32 2147483647, %v971_v9 }
 0xefc   :  { %v975_v5 = vmul.f32 %v1477_v23, %v974_v4 }
 0xefd   :  { %v999_v44 = vor.u32 1.1754944e-38, %v998_v41  ;;  %vm997_vm0 = vcmp.eq.f32.partialorder %v996_v42, 8.507059e+37 }
 0xefe   :  { %v976_v26 = vadd.f32 %v1477_v23, %v975_v5 }
 0xf00   :  { %v980_v31 = vsel %vm979_vm11, %v1477_v23, %v976_v26  ;;  %vm677_vm11 = vcmask 257027  }
 0xf01   :  { %v985_v34 = vsel %vm982_vm12, %v984_v32, %v980_v31  ;;  %v1481_v36 = vpop.eup %1480  ;;  %vm1052_vm12 = vcmask 260102  }
 0xf02   :  { %v988_v37 = vmul.f32 %v1481_v36, %v971_v9  ;;  %vm993_vm13 = vweird.f32 %v1481_v36  ;;  %v1010_v56 = vmul.f32 %v1006_v50, %v985_v34 }
 0xf03   :  { %vm994_vm15 = vmor %vm992_vm14, %vm993_vm13  ;;  %vm428_vm13 = vcmask 254977   ;;  %vm802_vm14 = vcmask 258052  }
 0xf04   :  { %v989_v38 = vsub.f32 1.0, %v988_v37 }
 0xf06   :  { %v990_v39 = vmul.f32 %v1481_v36, %v989_v38 }
 0xf08   :  { %v991_v40 = vadd.f32 %v1481_v36, %v990_v39 }
 0xf0a   :  { %v995_v43 = vsel %vm994_vm15, %v1481_v36, %v991_v40  ;;  %vm552_vm15 = vcmask 256002  }
 0xf0b   :  { %v1000_v46 = vsel %vm997_vm0, %v999_v44, %v995_v43  ;;  %vm927_vm0 = vcmask 259077  }
 0xf0c   :  { %v1011_v52 = vmul.f32 %v1007_v54, %v1000_v46 }
 0xf47   :  { %v1015_v33 = vpop.permute.xlu2 %1014 }
 0xf48   :  { %v1020_v35 = vmul.f32 %v1015_v33, %v985_v34 }
 0xf4a   :  { %1024 = vrot.lane.b32.xlu1 %v1020_v35, %s1716_s23 }
 0xf60   :  { %v1017_v45 = vpop.permute.xlu0 %1016 }
 0xf61   :  { %v1021_v48 = vmul.f32 %v1017_v45, %v1000_v46 }
 0xf63   :  { %1026 = vrot.lane.b32.xlu2 %v1021_v48, %s1716_s23 }
 0xfbc   :  { %v1025_v0 = vpop.permute.xlu1 %1024 }
 0xfbd   :  { %v1027_v55 = vpop.permute.xlu2 %1026  ;;  %v2041_v57 = vadd.f32 %v1025_v0, %v1010_v56 }
 0xfbe   :  { %v2043_v8 = vadd.f32 %v1027_v55, %v1011_v52 }
 0xfbf   :  { %1482 = vtanh.f32 %v2041_v57  ;;  %v1131_v52 = vrot.slane %v2041_v57, 7 }
 0xfc0   :  { %1484 = vtanh.f32 %v2043_v8 }
 0xfc5   :  { %v1483_v2 = vpop.eup %1482 }
 0xfc6   :  { %v1485_v47 = vpop.eup %1484  ;;  %1036 = vrot.lane.b32.xlu0 %v1483_v2, %s1717_s9 }
 0xfc7   :  { %1038 = vrot.lane.b32.xlu1 %v1485_v47, %s1717_s9 }
0x1038   :  { %v1037_v51 = vpop.permute.xlu0 %1036 }
0x1039   :  { %v1039_v49 = vpop.permute.xlu1 %1038  ;;  %v2049_v10 = vmul.f32 %v1037_v51, %v985_v34 }
0x103a   :  { %v2051_v11 = vmul.f32 %v1039_v49, %v1000_v46 }
0x103b   :  { %v1055_v12 = vrot.slane %v2049_v10, 6 }
0x103c   :  { %v1056_v13 = vrot.slane %v2051_v11, 5 }
0x103e   :  { %v1057_v15 = vsel %vm308_vm10, %v1056_v13, %v1055_v12 }
0x103f   :  { %1058 = vrot.lane.b32.xlu2 %v1057_v15, %s1716_s23 }
0x1099   :  { %v1059_v16 = vpop.permute.xlu2 %1058 }
0x109a   :  { %1350 = vmatmul.msk.f32.vlgmr.msra.gmra.mxu3 %vm149_vm1, %v1059_v16 }
0x111d   :  { %v1079_v18 = vpop.f32.mrf.mxu3 }
0x111e   :  { %v1083_v19 = vrot.slane %v1079_v18, 1  ;;  %v1084_v20 = vrot.slane %v1079_v18, 2 }
0x1120   :  { %v1087_v21 = vadd.f32 %v1083_v19, %v1880_v29  ;;  %v1088_v22 = vadd.f32 %v1084_v20, %v1877_v27  ;;  %v1201_v20 = vld [vmem:[%s2170_s6 + $0x10] sm:$0xff] }
0x1122   :  { %1486 = vtanh.f32 %v1087_v21  ;;  %v1351_v25 = vmul.f32 -1.442695, %v1087_v21  ;;  %v1352_v4 = vmul.f32 -1.442695, %v1088_v22  ;;  %v1200_v21 = vld [vmem:[%s2170_s6 + $0x8] sm:$0xff] }
0x1123   :  { %1488 = vtanh.f32 %v1088_v22  ;;  %v1199_v22 = vld [vmem:[%s2170_s6] sm:$0xff] }
0x1124   :  { %1490 = vpow2.f32 %v1351_v25 }
0x1125   :  { %1492 = vpow2.f32 %v1352_v4 }
0x1128   :  { %v1487_v23 = vpop.eup %1486 }
0x1129   :  { %v1489_v24 = vpop.eup %1488  ;;  %1139 = vrot.lane.b32.xlu0 %v1487_v23, %s1717_s9 }
0x112a   :  { %1141 = vrot.lane.b32.xlu1 %v1489_v24, %s1717_s9  ;;  %v1491_v5 = vpop.eup %1490 }
0x112b   :  { %v1493_v7 = vpop.eup %1492  ;;  %v1095_v9 = vadd.f32 1.0, %v1491_v5 }
0x112c   :  { %v1096_v26 = vadd.f32 1.0, %v1493_v7 }
0x112d   :  { %1494 = vrcp.f32 %v1095_v9  ;;  %v1108_v37 = vand.u32 2147483648, %v1095_v9  ;;  %vm1102_vm3 = vweird.f32 %v1095_v9  ;;  %v1106_v39 = vand.u32 2147483647, %v1095_v9 }
0x112e   :  { %1496 = vrcp.f32 %v1096_v26  ;;  %v1123_v38 = vand.u32 2147483648, %v1096_v26  ;;  %vm1117_vm4 = vweird.f32 %v1096_v26  ;;  %v1121_v40 = vand.u32 2147483647, %v1096_v26 }
0x112f   :  { %v1109_v43 = vor.u32 1.1754944e-38, %v1108_v37  ;;  %vm1107_vm7 = vcmp.eq.f32.partialorder %v1106_v39, 8.507059e+37 }
0x1130   :  { %v1124_v44 = vor.u32 1.1754944e-38, %v1123_v38  ;;  %vm1122_vm8 = vcmp.eq.f32.partialorder %v1121_v40, 8.507059e+37 }
0x1133   :  { %v1495_v29 = vpop.eup %1494 }
0x1134   :  { %v1497_v27 = vpop.eup %1496  ;;  %v1098_v28 = vmul.f32 %v1495_v29, %v1095_v9  ;;  %vm1103_vm10 = vweird.f32 %v1495_v29  ;;  %v1373_v9 = vld [vmem:[%s2171_s7] ss:$0 sm:$0xff]  ;;  %s1719_s7 = smov 120  }
0x1135   :  { %v1113_v30 = vmul.f32 %v1497_v27, %v1096_v26  ;;  %vm1118_vm2 = vweird.f32 %v1497_v27  ;;  %vm1104_vm5 = vmor %vm1102_vm3, %vm1103_vm10  ;;  %vm1177_vm10 = vcmask 261127  }
0x1136   :  { %v1099_v31 = vsub.f32 1.0, %v1098_v28  ;;  %vm1119_vm6 = vmor %vm1117_vm4, %vm1118_vm2  ;;  %vm1236_vm2 = vcmask 64512  }
0x1137   :  { %v1114_v32 = vsub.f32 1.0, %v1113_v30 }
0x1138   :  { %v1100_v33 = vmul.f32 %v1495_v29, %v1099_v31 }
0x1139   :  { %v1115_v34 = vmul.f32 %v1497_v27, %v1114_v32 }
0x113a   :  { %v1101_v35 = vadd.f32 %v1495_v29, %v1100_v33 }
0x113b   :  { %v1116_v36 = vadd.f32 %v1497_v27, %v1115_v34 }
0x113c   :  { %v1105_v41 = vsel %vm1104_vm5, %v1495_v29, %v1101_v35 }
0x113d   :  { %v1120_v42 = vsel %vm1119_vm6, %v1497_v27, %v1116_v36  ;;  %v1110_v46 = vsel %vm1107_vm7, %v1109_v43, %v1105_v41 }
0x113e   :  { %v1125_v50 = vsel %vm1122_vm8, %v1124_v44, %v1120_v42  ;;  %v1135_v0 = vmul.f32 %v1131_v52, %v1110_v46 }
0x119b   :  { %v1140_v45 = vpop.permute.xlu0 %1139 }
0x119c   :  { %v1142_v48 = vpop.permute.xlu1 %1141  ;;  %v1145_v54 = vmul.f32 %v1140_v45, %v1110_v46 }
0x119d   :  { %v1146_v56 = vmul.f32 %v1142_v48, %v1125_v50 }
0x119e   :  { %1149 = vrot.lane.b32.xlu2 %v1145_v54, %s1716_s23 }
0x119f   :  { %1151 = vrot.lane.b32.xlu0 %v1146_v56, %s1716_s23 }
0x11a7   :  { %298 = vrot.lane.b32.xlu0 %v1898_v17, %s1716_s23 }
0x11af   :  { %671 = vrot.lane.b32.xlu0 %v1974_v58, %s1716_s23  ;;  %v1132_v58 = vrot.slane %v2043_v8, 7 }
0x11b7   :  { %1046 = vrot.lane.b32.xlu0 %v2049_v10, %s1716_s23 }
0x11bf   :  { %424 = vrot.lane.b32.xlu0 %v1926_v6, %s1716_s23  ;;  %v1136_v6 = vmul.f32 %v1132_v58, %v1125_v50 }
0x11c7   :  { %798 = vrot.lane.b32.xlu0 %v2001_v63, %s1716_s23 }
0x11f8   :  { %v1150_v55 = vpop.permute.xlu2 %1149 }
0x11f9   :  { %v2075_v2 = vadd.f32 %v1150_v55, %v1135_v0 }
0x11fb   :  { %1498 = vtanh.f32 %v2075_v2 }
0x1201   :  { %v1499_v17 = vpop.eup %1498 }
0x1202   :  { %1161 = vrot.lane.b32.xlu1 %v1499_v17, %s1717_s9 }
0x120a   :  { %422 = vrot.lane.b32.xlu1 %v1924_v3, %s1716_s23 }
0x1211   :  { %v1152_v47 = vpop.permute.xlu0 %1151 }
0x1212   :  { %v2082_v51 = vadd.f32 %v1152_v47, %v1136_v6  ;;  %796 = vrot.lane.b32.xlu1 %v1999_v60, %s1716_s23 }
0x1214   :  { %1500 = vtanh.f32 %v2082_v51  ;;  %v1188_v36 = vrot.slane %v2082_v51, 7 }
0x1219   :  { %v299_v63 = vpop.permute.xlu0 %298 }
0x121a   :  { %v1501_v57 = vpop.eup %1500  ;;  %305 = vst.msk [vmem:[#allocation2] sm:$0x1] %vm304_vm9, %v299_v63  ;;  %548 = vrot.lane.b32.xlu1 %v1951_v62, %s1716_s23 }
0x121b   :  { %1163 = vrot.lane.b32.xlu2 %v1501_v57, %s1717_s9 }
0x1221   :  { %v672_v3 = vpop.permute.xlu0 %671 }
0x1222   :  { %678 = vst.msk [vmem:[#allocation2] sm:$0x8] %vm677_vm11, %v672_v3 }
0x1223   :  { %546 = vrot.lane.b32.xlu2 %v1949_v61, %s1716_s23 }
0x1229   :  { %v1047_v60 = vpop.permute.xlu0 %1046 }
0x122a   :  { %1053 = vst.msk [vmem:[#allocation2] sm:$0x40] %vm1052_vm12, %v1047_v60 }
0x122b   :  { %921 = vrot.lane.b32.xlu2 %v2024_v53, %s1716_s23 }
0x1231   :  { %v425_v8 = vpop.permute.xlu0 %424 }
0x1232   :  { %430 = vst.msk [vmem:[#allocation2 + $0x8] sm:$0x2] %vm428_vm13, %v425_v8 }
0x1233   :  { %300 = vrot.lane.b32.xlu2 %v1895_v14, %s1716_s23 }
0x1239   :  { %v799_v62 = vpop.permute.xlu0 %798 }
0x123a   :  { %804 = vst.msk [vmem:[#allocation2 + $0x8] sm:$0x10] %vm802_vm14, %v799_v62 }
0x123b   :  { %673 = vrot.lane.b32.xlu2 %v1976_v59, %s1716_s23 }
0x1243   :  { %1048 = vrot.lane.b32.xlu2 %v2051_v11, %s1716_s23 }
0x1274   :  { %v1162_v61 = vpop.permute.xlu1 %1161 }
0x1275   :  { %v1164_v49 = vpop.permute.xlu2 %1163  ;;  %v1167_v53 = vmul.f32 %v1162_v61, %v1110_v46 }
0x1276   :  { %v1168_v10 = vmul.f32 %v1164_v49, %v1125_v50 }
0x1277   :  { %1171 = vrot.lane.b32.xlu1 %v1167_v53, %s1716_s23 }
0x1278   :  { %1173 = vrot.lane.b32.xlu0 %v1168_v10, %s1716_s23  ;;  %v1180_v13 = vrot.slane %v1168_v10, 7 }
0x127c   :  { %v423_v14 = vpop.permute.xlu1 %422 }
0x127d   :  { %v547_v12 = vpop.permute.xlu2 %546  ;;  %429 = vst.msk [vmem:[#allocation2] sm:$0x2] %vm428_vm13, %v423_v14 }
0x127e   :  { %553 = vst.msk [vmem:[#allocation2] sm:$0x4] %vm552_vm15, %v547_v12 }
0x127f   :  { %923 = vrot.lane.b32.xlu1 %v2026_v1, %s1716_s23  ;;  %v1202_v1 = vld [vmem:[%s2170_s6 + $0x18] sm:$0xff] }
0x1280   :  { %1181 = vrot.lane.b32.xlu0 %v1180_v13, %s1716_s23  ;;  %1225 = vmatpush.msra.mxu0 %v1202_v1 }
0x1282   :  { %1226 = vmatpush.msra.mxu0 %v1201_v20 }
0x1284   :  { %v797_v59 = vpop.permute.xlu1 %796  ;;  %1227 = vmatpush.msra.mxu0 %v1200_v21 }
0x1285   :  { %v922_v11 = vpop.permute.xlu2 %921  ;;  %803 = vst.msk [vmem:[#allocation2] sm:$0x10] %vm802_vm14, %v797_v59 }
0x1286   :  { %928 = vst.msk [vmem:[#allocation2] sm:$0x20] %vm927_vm0, %v922_v11  ;;  %1228 = vmatpush.msra.mxu0 %v1199_v22 }
0x128c   :  { %v549_v15 = vpop.permute.xlu1 %548 }
0x128d   :  { %v301_v16 = vpop.permute.xlu2 %300  ;;  %554 = vst.msk [vmem:[#allocation2 + $0x8] sm:$0x4] %vm552_vm15, %v549_v15 }
0x128e   :  { %306 = vst.msk [vmem:[#allocation2 + $0x8] sm:$0x1] %vm304_vm9, %v301_v16 }
0x1295   :  { %v674_v18 = vpop.permute.xlu2 %673 }
0x1296   :  { %679 = vst.msk [vmem:[#allocation2 + $0x8] sm:$0x8] %vm677_vm11, %v674_v18 }
0x129d   :  { %v1049_v19 = vpop.permute.xlu2 %1048 }
0x129e   :  { %1054 = vst.msk [vmem:[#allocation2 + $0x8] sm:$0x40] %vm1052_vm12, %v1049_v19 }
0x12e9   :  { %v1172_v23 = vpop.permute.xlu1 %1171 }
0x12ea   :  { %v1174_v24 = vpop.permute.xlu0 %1173  ;;  %1178 = vst.msk [vmem:[#allocation2] sm:$0x80] %vm1177_vm10, %v1172_v23 }
0x12eb   :  { %1179 = vst.msk [vmem:[#allocation2 + $0x8] sm:$0x80] %vm1177_vm10, %v1174_v24 }
0x12ec   :  { %1184 = vst.msk [vmem:[#allocation14 - $0x7] sm:$0x80] %vm1177_vm10, %v1172_v23 }
0x12f1   :  { %v924_v25 = vpop.permute.xlu1 %923  ;;  %v1197_v4 = vld [vmem:[#allocation2] sm:$0xff] }
0x12f2   :  { %v1182_v5 = vpop.permute.xlu0 %1181  ;;  %929 = vst.msk [vmem:[#allocation2 + $0x8] sm:$0x20] %vm927_vm0, %v924_v25  ;;  %1353 = vmatmul.msk.f32.vlgmr.msra.gmra.mxu0 %vm149_vm1, %v1197_v4 }
0x12f3   :  { %1185 = vst.msk [vmem:[#allocation14 + $0x1] sm:$0x1] %vm304_vm9, %v1182_v5 }
0x12f9   :  { %v1198_v7 = vld [vmem:[#allocation2 + $0x8] sm:$0xff] }
0x12fa   :  { %1354 = vmatmul.msk.f32.gmra.mxu0 %vm149_vm1, %v1198_v7 }
0x136f   :  { %v1230_v26 = vpop.f32.mrf.mxu0 }
0x1370   :  { %v1231_v29 = vadd.f32 %v1373_v9, %v1230_v26 }
0x1372   :  { %1237 = vst.msk [vmem:[#allocation11] sm:$0xff] %vm1236_vm2, %v1231_v29  ;;  %v1239_v27 = vmul.f32 0.5, %v1231_v29 }
0x1374   :  { %v1241_v28 = vmul.f32 1.442695, %v1239_v27 }
0x1376   :  { %1502 = vpow2.f32 %v1241_v28 }
0x1377   :  { %v1233_v30 = vpop.f32.mrf.mxu0 }
0x1378   :  { %v1234_v31 = vadd.f32 %v1373_v9, %v1233_v30 }
0x137a   :  { %1238 = vst.msk [vmem:[#allocation11 + $0x8] sm:$0xff] %vm1236_vm2, %v1234_v31  ;;  %v1240_v32 = vmul.f32 0.5, %v1234_v31 }
0x137b   :  { %1267 = dma.vmem_to_hbm [thread:$0]  %s1260_s16, 256, %s1262_s15, [#allocation5], %s1712_s18, %s1712_s18, %s1713_s19  }
0x137c   :  { %v1503_v33 = vpop.eup %1502  ;;  %v1243_v34 = vmul.f32 1.442695, %v1240_v32 }
0x137d   :  { %1247 = vrot.lane.b32.xlu1 %v1503_v33, %s1719_s7 }
0x137e   :  { %1504 = vpow2.f32 %v1243_v34 }
0x1384   :  { %v1505_v35 = vpop.eup %1504 }
0x1385   :  { %1189 = vrot.lane.b32.xlu1 %v2075_v2, %s1720_s17  ;;  %1249 = vrot.lane.b32.xlu2 %v1505_v35, %s1719_s7 }
0x138d   :  { %1191 = vrot.lane.b32.xlu2 %v1188_v36, %s1720_s17 }
0x13df   :  { %v1250_v37 = vpop.permute.xlu2 %1249 }
0x13e0   :  { %1254 = vst.msk [vmem:[#allocation12 + $0x8] sm:$0xff] %vm1236_vm2, %v1250_v37 }
0x13e7   :  { %v1192_v38 = vpop.permute.xlu2 %1191 }
0x13e8   :  { %1196 = vst.msk [vmem:[#allocation15 + $0x1] sm:$0x1] %vm304_vm9, %v1192_v38 }
0x13ef   :  { %v1248_v39 = vpop.permute.xlu1 %1247 }
0x13f0   :  { %1253 = vst.msk [vmem:[#allocation12] sm:$0xff] %vm1236_vm2, %v1248_v39 }
0x13f1   :  { %1280 = dma.vmem_to_hbm [thread:$0]  %s1273_s2, 256, %s1275_s22, [#allocation13], %s1712_s18, %s1712_s18, %s1713_s19  }
0x13f2   :  { %1291 = dma.vmem_to_hbm [thread:$0]  %s1287_s8, 32, %s1289_s1, [#allocation13]  }
0x13f7   :  { %v1190_v40 = vpop.permute.xlu1 %1189 }
0x13f8   :  { %1195 = vst.msk [vmem:[#allocation15 - $0x7] sm:$0x80] %vm1177_vm10, %v1190_v40 }
0x13f9   :  { %1302 = dma.vmem_to_hbm [thread:$0]  %s1298_s11, 32, %s1300_s27, [#allocation16]  }
0x13fa   :  { %1704 = dma.done.wait [#allocation5], 256  }
0x13fb   :  { %1705 = vsyncadd [#allocation5], 4294967040 }
0x13fc   :  { %1706 = dma.done.wait [#allocation13], 288  }
0x13fd   :  { %1707 = vsyncadd [#allocation13], 4294967008 }
0x13fe   :  { %1708 = dma.done.wait [#allocation16], 32  }
0x13ff   :  { %1709 = vsyncadd [#allocation16], 4294967264 }
0x1400   :  { %1319 = vsyncpa [#allocation4], 1 }
0x1401   :  { %1320 = vsyncpa [#allocation7], 1 }
0x1402   :  { %1321 = vsyncpa [#allocation10], 1 }
0x1403   :  { %1322 = vsyncpa [#allocation5], 1 }
0x1404   :  { %1323 = vsyncpa [#allocation13], 1 }
0x1405   :  { %1324 = vsyncpa [#allocation16], 1 }

</bundles_post_ra>
